<compile_context>
chip_gen: v7x
topology: tpu7x:2x2x1
jax: 0.10.0
libtpu: 0.0.40
codegen_flags: <defaults>
</compile_context>

<pallas_src>
import functools
from typing import List, Tuple

import numpy as np
import jax
import jax.numpy as jnp
from jax.experimental import pallas as pl
from jax.experimental.pallas import tpu as pltpu

_BN_EPS = 1e-5


def _round_up(x: int, m: int) -> int:
    return (x + m - 1) // m * m


# ----------------------------------------------------------------------------
# Fused kernel: a = relu(a @ M_l + b_l) for l = 0..L-2, then a @ M_{L-1} + b_{L-1}.
# (Conv layers are matmuls against unrolled Toeplitz matrices; BN is pre-folded
#  into the next matrix/bias; Flatten is a no-op in the flattened-NCHW layout.)
# ----------------------------------------------------------------------------
def _encoder_kernel(*refs, n_layers: int, widths: Tuple[int, ...]):
    """refs = (x_ref, M_0, ..., M_{L-1}, bias_concat_ref, out_ref)."""
    x_ref = refs[0]
    mat_refs = refs[1:1 + n_layers]
    bias_ref = refs[1 + n_layers]
    out_ref = refs[2 + n_layers]

    a = x_ref[...]                                  # f32 [bt, d_in_pad]
    off = 0
    for l in range(n_layers):
        w = widths[l]
        m = mat_refs[l][...]                        # bf16 weights (MXU-rate)
        a = jnp.dot(a.astype(m.dtype), m, preferred_element_type=jnp.float32)
        a = a + bias_ref[:, off:off + w]            # f32 elementwise (v5e-safe)
        if l < n_layers - 1:
            a = jnp.maximum(a, 0.0)                 # ReLU on all but last layer
        off += w

    out_ref[...] = a.astype(out_ref.dtype)


# ----------------------------------------------------------------------------
# Host-side folding: conv -> Toeplitz matmul, BN -> folded into next layer,
# widths padded to multiples of 128, weights cast to bf16, biases concatenated.
# ----------------------------------------------------------------------------
def _conv_out_hw(h: int, w: int, k: int, s: int) -> Tuple[int, int]:
    return (h - k) // s + 1, (w - k) // s + 1


def _build_conv_matrix(w_np: np.ndarray, h: int, w: int, stride: int) -> np.ndarray:
    """Unroll a VALID-padding Conv2d into a dense [Cin*H*W, Cout*OH*OW] matrix.

    Row index = ci*H*W + y*W + x      (torch NCHW flatten of the conv input)
    Col index = co*OH*OW + oy*OW + ox (torch NCHW flatten of the conv output)
    """
    cout, cin, kh, kw = w_np.shape
    oh, ow = _conv_out_hw(h, w, kh, stride)
    m = np.zeros((cin * h * w, cout * oh * ow), dtype=w_np.dtype)
    ci = np.arange(cin)
    co = np.arange(cout)
    for ky in range(kh):
        for kx in range(kw):
            blk = w_np[:, :, ky, kx].T              # [Cin, Cout]
            for oy in range(oh):
                y = oy * stride + ky
                for ox in range(ow):
                    x = ox * stride + kx
                    rows = (ci * h + y) * w + x
                    cols = (co * oh + oy) * ow + ox
                    m[np.ix_(rows, cols)] = blk
    return m


def build_fused_layers(conv_params, bn_params, strides, dense_params, h, w):
    """Return (bf16 matrices, f32 concatenated bias row, padded widths,
    d_in_padded, real output width).  BN folded forward, widths padded to 128."""
    layers = []          # unpadded (matrix, bias_row) in f64
    pending = None       # (scale_row, shift_row) from the previous block's BN

    for (wt, b), (gamma, beta, mean, var), s in zip(conv_params, bn_params, strides):
        wt_np = np.asarray(wt, np.float64)
        m = _build_conv_matrix(wt_np, h, w, s)
        _, _, kh, _ = wt_np.shape
        oh, ow = _conv_out_hw(h, w, kh, s)
        b_row = np.repeat(np.asarray(b, np.float64), oh * ow)[None, :]
        if pending is not None:
            s_row, sh_row = pending
            assert s_row.shape[1] == m.shape[0]
            b_row = b_row + sh_row @ m
            m = s_row.reshape(-1, 1) * m
        layers.append((m, b_row))
        scale = np.asarray(gamma, np.float64) / np.sqrt(np.asarray(var, np.float64) + _BN_EPS)
        shift = np.asarray(beta, np.float64) - np.asarray(mean, np.float64) * scale
        pending = (np.repeat(scale, oh * ow)[None, :], np.repeat(shift, oh * ow)[None, :])
        h, w = oh, ow

    for w_, b_ in dense_params:
        m = np.asarray(w_, np.float64)              # [in, out]
        b_row = np.asarray(b_, np.float64).reshape(1, -1)
        if pending is not None:                     # last conv BN -> first dense
            s_row, sh_row = pending
            assert s_row.shape[1] == m.shape[0]
            b_row = b_row + sh_row @ m
            m = s_row.reshape(-1, 1) * m
            pending = None
        layers.append((m, b_row))

    d_out_real = layers[-1][0].shape[1]

    # Zero-pad every layer width (cols + bias, and next layer's rows) to 128.
    mats, biases, widths = [], [], []
    rows_pad = _round_up(layers[0][0].shape[0], 128)
    for m, b_row in layers:
        r, c = m.shape
        c_pad = _round_up(c, 128)
        mp = np.zeros((rows_pad, c_pad), np.float32)
        mp[:r, :c] = m
        bp = np.zeros((1, c_pad), np.float32)
        bp[:, :c] = b_row
        mats.append(mp)
        biases.append(bp)
        widths.append(c_pad)
        rows_pad = c_pad

    bias_cat = np.concatenate(biases, axis=1)       # one resident bias array
    d_in_pad = mats[0].shape[0]
    return ([jnp.asarray(m, jnp.bfloat16) for m in mats],
            jnp.asarray(bias_cat, jnp.float32),
            tuple(widths), d_in_pad, d_out_real)


# ----------------------------------------------------------------------------
# Forward wrapper: one pallas_call, batch-tiled "parallel" grid, weights resident.
# ----------------------------------------------------------------------------
def small_conv_encoder_forward(x: jax.Array, mats, bias_cat, widths, d_out,
                               *, batch_tile: int = 256) -> jax.Array:
    bsz = x.shape[0]
    x2d = x.reshape(bsz, -1).astype(jnp.float32)    # NCHW flatten
    d_in = x2d.shape[1]
    d_in_pad = mats[0].shape[0]
    d_out_pad = widths[-1]
    n_layers = len(mats)

    # Sublane-aligned batch tile; prefer >=2 grid steps when the batch allows
    # so the "parallel" axis shards across both TensorCores on v7x.
    bt = min(batch_tile, _round_up(bsz, 8))
    if bsz > 8 and bt >= bsz:
        half = max(8, _round_up((bsz + 1) // 2, 8))
        if half < bt:
            bt = half
    num_tiles = pl.cdiv(bsz, bt)
    bp = num_tiles * bt
    if bp != bsz or d_in_pad != d_in:
        x2d = jnp.pad(x2d, ((0, bp - bsz), (0, d_in_pad - d_in)))

    in_specs = [pl.BlockSpec((bt, d_in_pad), lambda i: (i, 0))]   # x: batch-tiled
    for m in mats:                                                # weights: resident
        in_specs.append(pl.BlockSpec(m.shape, lambda i: (0, 0)))
    in_specs.append(pl.BlockSpec(bias_cat.shape, lambda i: (0, 0)))
    # NOTE: constant-index-map params are grid-invariant; if weight VMEM becomes
    # the budget at scale, single-buffer them (pipeline_mode) or go manual-DMA.

    kernel = functools.partial(_encoder_kernel, n_layers=n_layers,
                               widths=tuple(widths))

    # Advisory cost + explicit VMEM budget (re-derived, v7x-safe).
    flops = 2 * bp * sum(int(m.shape[0]) * int(m.shape[1]) for m in mats)
    param_bytes = (sum(int(m.size) * m.dtype.itemsize for m in mats)
                   + int(bias_cat.size) * bias_cat.dtype.itemsize)
    bytes_accessed = int(x2d.size) * 4 + param_bytes + bp * d_out_pad * 4
    cost = pl.CostEstimate(flops=flops, transcendentals=0,
                           bytes_accessed=int(bytes_accessed))
    act_bytes = bt * max([d_in_pad] + list(widths)) * 4
    vmem_est = (2 * bt * d_in_pad * 4 + 2 * param_bytes
                + 2 * bt * d_out_pad * 4 + 4 * act_bytes)
    vmem_limit = int(min(max(2 * vmem_est, 32 * 1024 * 1024), 64 * 1024 * 1024))

    out = pl.pallas_call(
        kernel,
        out_shape=jax.ShapeDtypeStruct((bp, d_out_pad), jnp.float32),
        grid=(num_tiles,),
        in_specs=in_specs,
        out_specs=pl.BlockSpec((bt, d_out_pad), lambda i: (i, 0)),
        compiler_params=pltpu.CompilerParams(
            dimension_semantics=("parallel",),
            vmem_limit_bytes=vmem_limit),
        cost_estimate=cost,
    )(x2d, *mats, bias_cat)
    return out[:bsz, :d_out]


# ----------------------------------------------------------------------------
# Deterministic param init mirroring the torch module's layer shapes.
# (torch Linear weights are [out,in]; this init uses [in,out] directly.)
# ----------------------------------------------------------------------------
def init_small_conv_encoder_params(key, nbr_channels_start, kernel_sizes,
                                   channels, strides, dense_widths,
                                   dtype=jnp.float32):
    conv_params, bn_params = [], []
    cin = nbr_channels_start
    for ksz, cout in zip(kernel_sizes, channels):
        key, kw_, kb_, kg, kbt, km, kv = jax.random.split(key, 7)
        bound = 1.0 / float(np.sqrt(cin * ksz * ksz))
        w = jax.random.uniform(kw_, (cout, cin, ksz, ksz), dtype, -bound, bound)
        b = jax.random.uniform(kb_, (cout,), dtype, -bound, bound)
        gamma = jax.random.uniform(kg, (cout,), dtype, 0.5, 1.5)
        beta = jax.random.uniform(kbt, (cout,), dtype, -0.5, 0.5)
        mean = 0.5 * jax.random.normal(km, (cout,), dtype)
        var = jax.random.uniform(kv, (cout,), dtype, 0.5, 1.5)
        conv_params.append((w, b))
        bn_params.append((gamma, beta, mean, var))
        cin = cout
    dense_params = []
    for i in range(len(dense_widths) - 1):
        fin, fout = dense_widths[i], dense_widths[i + 1]
        key, kw_, kb_ = jax.random.split(key, 3)
        bound = 1.0 / float(np.sqrt(fin))
        w = jax.random.uniform(kw_, (fin, fout), dtype, -bound, bound)
        b = jax.random.uniform(kb_, (1, fout), dtype, -bound, bound)
        dense_params.append((w, b))
    return conv_params, bn_params, dense_params


# ----------------------------------------------------------------------------
# Pure-JAX reference (eval-mode BN, f32 HIGHEST precision) for correctness.
# ----------------------------------------------------------------------------
def _reference_forward(x, conv_params, bn_params, strides, dense_params):
    a = x
    for (w, b), (gamma, beta, mean, var), s in zip(conv_params, bn_params, strides):
        a = jax.lax.conv_general_dilated(
            a, w, window_strides=(s, s), padding="VALID",
            dimension_numbers=("NCHW", "OIHW", "NCHW"),
            precision=jax.lax.Precision.HIGHEST)
        a = a + b.reshape(1, -1, 1, 1)
        a = jnp.maximum(a, 0.0)
        inv = (gamma / jnp.sqrt(var + _BN_EPS)).reshape(1, -1, 1, 1)
        a = (a - mean.reshape(1, -1, 1, 1)) * inv + beta.reshape(1, -1, 1, 1)
    a = a.reshape(a.shape[0], -1)
    n = len(dense_params)
    for i, (w, b) in enumerate(dense_params):
        a = jnp.dot(a, w, precision=jax.lax.Precision.HIGHEST) + b
        if i < n - 1:
            a = jnp.maximum(a, 0.0)
    return a


if __name__ == "__main__":
    # x: [2, 4, 16, 16]; conv 4->8 (k3,s2) => [2,8,7,7]; conv 8->16 (k3,s2) => [2,16,3,3]
    # Flatten => 144; dense_widths = [144, 64, 128] => output [2, 128]
    nbr_channels_start, height, width = 4, 16, 16
    kernel_sizes = [3, 3]
    channels = [8, 16]
    strides = [2, 2]
    dense_widths = [144, 64, 128]
    batch = 2

    key = jax.random.PRNGKey(0)
    key, kx = jax.random.split(key)
    x = jax.random.normal(kx, (batch, nbr_channels_start, height, width), jnp.float32)

    conv_params, bn_params, dense_params = init_small_conv_encoder_params(
        key, nbr_channels_start, kernel_sizes, channels, strides, dense_widths)

    mats, bias_cat, widths, d_in_pad, d_out = build_fused_layers(
        conv_params, bn_params, strides, dense_params, height, width)
    assert d_out == dense_widths[-1], (d_out, dense_widths[-1])

    out = small_conv_encoder_forward(x, mats, bias_cat, widths, d_out)
    out = jax.block_until_ready(out)

    ref = _reference_forward(x, conv_params, bn_params, strides, dense_params)
    assert out.shape == (batch, dense_widths[-1]), out.shape
    # bf16 dot operands: typical max |err| ~5e-3 at these shapes; structural
    # errors are O(0.1+), so 5e-2 still catches any real bug.
    max_err = float(jnp.max(jnp.abs(out - ref)))
    assert max_err < 5e-2, f"mismatch vs reference: max |err| = {max_err}"

    print("KERNEL_OK")
</pallas_src>

<mosaic_0001>
module attributes {stable_mosaic.version = 11 : i64} {
  func.func @_encoder_kernel(%arg0: i32, %arg1: memref<8x1024xf32, #tpu.memory_space<vmem>>, %arg2: memref<1024x512xbf16, #tpu.memory_space<vmem>>, %arg3: memref<512x256xbf16, #tpu.memory_space<vmem>>, %arg4: memref<256x128xbf16, #tpu.memory_space<vmem>>, %arg5: memref<128x128xbf16, #tpu.memory_space<vmem>>, %arg6: memref<1x1024xf32, #tpu.memory_space<vmem>>, %arg7: memref<8x128xf32, #tpu.memory_space<vmem>>) attributes {dimension_semantics = [#tpu.dimension_semantics<parallel>], iteration_bounds = array<i64: 1>, scalar_prefetch = 0 : i64, scratch_operands = 0 : i64, tpu.core_type = #tpu.core_type<tc>, window_params = [{transform_indices = @transform_0, window_bounds = array<i64: 8, 1024>}, {pipeline_mode = #tpu.pipeline_mode<synchronous>, transform_indices = @transform_1, window_bounds = array<i64: 1024, 512>}, {pipeline_mode = #tpu.pipeline_mode<synchronous>, transform_indices = @transform_2, window_bounds = array<i64: 512, 256>}, {pipeline_mode = #tpu.pipeline_mode<synchronous>, transform_indices = @transform_3, window_bounds = array<i64: 256, 128>}, {pipeline_mode = #tpu.pipeline_mode<synchronous>, transform_indices = @transform_4, window_bounds = array<i64: 128, 128>}, {pipeline_mode = #tpu.pipeline_mode<synchronous>, transform_indices = @transform_5, window_bounds = array<i64: 1, 1024>}, {transform_indices = @transform_6, window_bounds = array<i64: 8, 128>}]} {
    %c0 = arith.constant 0 : index
    %c0_0 = arith.constant 0 : index
    %0 = vector.load %arg1[%c0, %c0_0] : memref<8x1024xf32, #tpu.memory_space<vmem>>, vector<8x1024xf32>
    %c0_1 = arith.constant 0 : index
    %c0_2 = arith.constant 0 : index
    %1 = vector.load %arg2[%c0_1, %c0_2] : memref<1024x512xbf16, #tpu.memory_space<vmem>>, vector<1024x512xbf16>
    %2 = arith.truncf %0 : vector<8x1024xf32> to vector<8x1024xbf16>
    %cst = arith.constant dense<0.000000e+00> : vector<8x512xf32>
    %3 = tpu.matmul %2, %1, %cst {dimension_numbers = #tpu.dot_dimension_numbers<[1], [0], [0], [1], [0, 0, 1, 1], [], []>} : vector<8x1024xbf16>, vector<1024x512xbf16>, vector<8x512xf32> -> vector<8x512xf32>
    %c0_3 = arith.constant 0 : index
    %c0_4 = arith.constant 0 : index
    %4 = vector.load %arg6[%c0_3, %c0_4] : memref<1x1024xf32, #tpu.memory_space<vmem>>, vector<1x512xf32>
    %5 = vector.broadcast %4 : vector<1x512xf32> to vector<8x512xf32>
    %6 = arith.addf %3, %5 : vector<8x512xf32>
    %cst_5 = arith.constant 0.000000e+00 : f32
    %7 = vector.broadcast %cst_5 : f32 to vector<8x512xf32>
    %8 = arith.maximumf %6, %7 : vector<8x512xf32>
    %c0_6 = arith.constant 0 : index
    %c0_7 = arith.constant 0 : index
    %9 = vector.load %arg3[%c0_6, %c0_7] : memref<512x256xbf16, #tpu.memory_space<vmem>>, vector<512x256xbf16>
    %10 = arith.truncf %8 : vector<8x512xf32> to vector<8x512xbf16>
    %cst_8 = arith.constant dense<0.000000e+00> : vector<8x256xf32>
    %11 = tpu.matmul %10, %9, %cst_8 {dimension_numbers = #tpu.dot_dimension_numbers<[1], [0], [0], [1], [0, 0, 1, 1], [], []>} : vector<8x512xbf16>, vector<512x256xbf16>, vector<8x256xf32> -> vector<8x256xf32>
    %c0_9 = arith.constant 0 : index
    %c512 = arith.constant 512 : index
    %12 = vector.load %arg6[%c0_9, %c512] : memref<1x1024xf32, #tpu.memory_space<vmem>>, vector<1x256xf32>
    %13 = vector.broadcast %12 : vector<1x256xf32> to vector<8x256xf32>
    %14 = arith.addf %11, %13 : vector<8x256xf32>
    %cst_10 = arith.constant 0.000000e+00 : f32
    %15 = vector.broadcast %cst_10 : f32 to vector<8x256xf32>
    %16 = arith.maximumf %14, %15 : vector<8x256xf32>
    %c0_11 = arith.constant 0 : index
    %c0_12 = arith.constant 0 : index
    %17 = vector.load %arg4[%c0_11, %c0_12] : memref<256x128xbf16, #tpu.memory_space<vmem>>, vector<256x128xbf16>
    %18 = arith.truncf %16 : vector<8x256xf32> to vector<8x256xbf16>
    %cst_13 = arith.constant dense<0.000000e+00> : vector<8x128xf32>
    %19 = tpu.matmul %18, %17, %cst_13 {dimension_numbers = #tpu.dot_dimension_numbers<[1], [0], [0], [1], [0, 0, 1, 1], [], []>} : vector<8x256xbf16>, vector<256x128xbf16>, vector<8x128xf32> -> vector<8x128xf32>
    %c0_14 = arith.constant 0 : index
    %c768 = arith.constant 768 : index
    %20 = vector.load %arg6[%c0_14, %c768] : memref<1x1024xf32, #tpu.memory_space<vmem>>, vector<1x128xf32>
    %21 = vector.broadcast %20 : vector<1x128xf32> to vector<8x128xf32>
    %22 = arith.addf %19, %21 : vector<8x128xf32>
    %cst_15 = arith.constant 0.000000e+00 : f32
    %23 = vector.broadcast %cst_15 : f32 to vector<8x128xf32>
    %24 = arith.maximumf %22, %23 : vector<8x128xf32>
    %c0_16 = arith.constant 0 : index
    %c0_17 = arith.constant 0 : index
    %25 = vector.load %arg5[%c0_16, %c0_17] : memref<128x128xbf16, #tpu.memory_space<vmem>>, vector<128x128xbf16>
    %26 = arith.truncf %24 : vector<8x128xf32> to vector<8x128xbf16>
    %cst_18 = arith.constant dense<0.000000e+00> : vector<8x128xf32>
    %27 = tpu.matmul %26, %25, %cst_18 {dimension_numbers = #tpu.dot_dimension_numbers<[1], [0], [0], [1], [0, 0, 1, 1], [], []>} : vector<8x128xbf16>, vector<128x128xbf16>, vector<8x128xf32> -> vector<8x128xf32>
    %c0_19 = arith.constant 0 : index
    %c896 = arith.constant 896 : index
    %28 = vector.load %arg6[%c0_19, %c896] : memref<1x1024xf32, #tpu.memory_space<vmem>>, vector<1x128xf32>
    %29 = vector.broadcast %28 : vector<1x128xf32> to vector<8x128xf32>
    %30 = arith.addf %27, %29 : vector<8x128xf32>
    %c0_20 = arith.constant 0 : index
    %c0_21 = arith.constant 0 : index
    %31 = vector.load %arg7[%c0_20, %c0_21] : memref<8x128xf32, #tpu.memory_space<vmem>>, vector<8x128xf32>
    tpu.vector_store %arg7[%c0_20, %c0_21], %30 {strides = array<i32>} : memref<8x128xf32, #tpu.memory_space<vmem>>, vector<8x128xf32>,
    return
  }
  func.func @transform_0(%arg0: i32) -> (i32, i32) {
    %c0_i32 = arith.constant 0 : i32
    %c0_i32_0 = arith.constant 0 : i32
    return %arg0, %c0_i32 : i32, i32
  }
  func.func @transform_1(%arg0: i32) -> (i32, i32) {
    %c0_i32 = arith.constant 0 : i32
    %c0_i32_0 = arith.constant 0 : i32
    %c0_i32_1 = arith.constant 0 : i32
    return %c0_i32, %c0_i32_0 : i32, i32
  }
  func.func @transform_2(%arg0: i32) -> (i32, i32) {
    %c0_i32 = arith.constant 0 : i32
    %c0_i32_0 = arith.constant 0 : i32
    %c0_i32_1 = arith.constant 0 : i32
    return %c0_i32, %c0_i32_0 : i32, i32
  }
  func.func @transform_3(%arg0: i32) -> (i32, i32) {
    %c0_i32 = arith.constant 0 : i32
    %c0_i32_0 = arith.constant 0 : i32
    %c0_i32_1 = arith.constant 0 : i32
    return %c0_i32, %c0_i32_0 : i32, i32
  }
  func.func @transform_4(%arg0: i32) -> (i32, i32) {
    %c0_i32 = arith.constant 0 : i32
    %c0_i32_0 = arith.constant 0 : i32
    %c0_i32_1 = arith.constant 0 : i32
    return %c0_i32, %c0_i32_0 : i32, i32
  }
  func.func @transform_5(%arg0: i32) -> (i32, i32) {
    %c0_i32 = arith.constant 0 : i32
    %c0_i32_0 = arith.constant 0 : i32
    %c0_i32_1 = arith.constant 0 : i32
    return %c0_i32, %c0_i32_0 : i32, i32
  }
  func.func @transform_6(%arg0: i32) -> (i32, i32) {
    %c0_i32 = arith.constant 0 : i32
    %c0_i32_0 = arith.constant 0 : i32
    return %arg0, %c0_i32 : i32, i32
  }
}

</mosaic_0001>

<bundles_post_ra>
// kernel: tpu_custom_call.1
= control target key start
LH: loop header
LB: loop body
LE: loop exit
PB: predicated region body
PF: predicated region fallthrough
CT: control target
= control target key end

     0   :  { %11 = vsyncpa [#allocation3], 0  ;;  %s4047_s0 = inlined_call_operand.hbm [shape: f32[8,1024], index: 0, kind: input, shape index: {}]   ;;  %s4048_s1 = inlined_call_operand.hbm [shape: bf16[1024,512], index: 1, kind: input, shape index: {}]   ;;  %s4049_s2 = inlined_call_operand.hbm [shape: bf16[512,256], index: 2, kind: input, shape index: {}]   ;;  %s4050_s3 = inlined_call_operand.hbm [shape: bf16[256,128], index: 3, kind: input, shape index: {}]   ;;  %s4051_s4 = inlined_call_operand.hbm [shape: bf16[128,128], index: 4, kind: input, shape index: {}]   ;;  %s4052_s5 = inlined_call_operand.vmem [shape: f32[1,1024], index: 5, kind: input, shape index: {}]   ;;  %s4053_s6 = inlined_call_operand.hbm [shape: f32[8,128], index: 6, kind: output, shape index: {}]  }
   0x1   :  { %12 = vsyncpa [#allocation6], 0 }
   0x2   :  { %13 = vsyncpa [#allocation9], 0 }
   0x3   :  { %14 = vsyncpa [#allocation4], 0  ;;  %s3878_s21 = smov [#allocation5]   ;;  %s3738_s25 = scalar_lea.hbm %s4048_s1, 32768 }
   0x4   :  { %s30_s22 = sshll.u32 %s3878_s21, 4  ;;  %p3739_p0 = scmp.ne.s32.totalorder %s4048_s1, %s3738_s25  ;;  %s31_s22 = int_to_ptr.vmem [resolvable:$true] %s30_s22 }
   0x5   :  { %p3742_p1 = scmp.lt.u32.totalorder %s3738_s25, %s4048_s1 }
   0x7   :  { %p3744_p2 = pnand %p3742_p1, %p3739_p0 }
   0x9   :  { %3747 = shalt.err (!%p3744_p2)
}
   0xa   :  { %s3748_s30 = scalar_lea.vmem %s31_s22, 32768  ;;  %p3753_p4 = scmp.lt.s32.totalorder %s31_s22, %s31_s22 }
   0xb   :  { %p3749_p3 = scmp.ne.s32.totalorder %s31_s22, %s3748_s30  ;;  %p3754_p5 = scmp.lt.s32.totalorder %s3748_s30, %s3748_s30 }
   0xd   :  { %p3755_p6 = por %p3754_p5, %p3753_p4 }
   0xf   :  { %p3756_p7 = pnand %p3755_p6, %p3749_p3 }
  0x11   :  { %3759 = shalt.err (!%p3756_p7)
}
  0x12   :  { %s3879_s7 = smov 256   ;;  %s3880_s8 = smov 16  }
  0x13   :  { %36 = dma.hbm_to_vmem [thread:$0]  %s4048_s1, 32768, %s31_s22, [#allocation6], %s3879_s7, %s3879_s7, %s3880_s8  }
  0x14   :  { %s3881_s11 = smov [#allocation8]   ;;  %s3760_s15 = scalar_lea.hbm %s4050_s3, 2048 }
  0x15   :  { %s54_s12 = sshll.u32 %s3881_s11, 4  ;;  %p3761_p8 = scmp.ne.s32.totalorder %s4050_s3, %s3760_s15  ;;  %s55_s12 = int_to_ptr.vmem [resolvable:$true] %s54_s12 }
  0x16   :  { %p3764_p9 = scmp.lt.u32.totalorder %s3760_s15, %s4050_s3 }
  0x18   :  { %p3766_p10 = pnand %p3764_p9, %p3761_p8 }
  0x1a   :  { %3769 = shalt.err (!%p3766_p10)
}
  0x1b   :  { %s3770_s20 = scalar_lea.vmem %s55_s12, 2048  ;;  %p3775_p12 = scmp.lt.s32.totalorder %s55_s12, %s55_s12 }
  0x1c   :  { %p3771_p11 = scmp.ne.s32.totalorder %s55_s12, %s3770_s20  ;;  %p3776_p13 = scmp.lt.s32.totalorder %s3770_s20, %s3770_s20 }
  0x1e   :  { %p3777_p0 = por %p3776_p13, %p3775_p12 }
  0x20   :  { %p3778_p1 = pnand %p3777_p0, %p3771_p11 }
  0x22   :  { %3781 = shalt.err (!%p3778_p1)
}
  0x23   :  { %s3882_s1 = smov 64   ;;  %s3883_s21 = smov 4  }
  0x24   :  { %60 = dma.hbm_to_vmem [thread:$0]  %s4050_s3, 2048, %s55_s12, [#allocation9], %s3882_s1, %s3882_s1, %s3883_s21  }
  0x25   :  { %s3884_s24 = smov [#allocation2]   ;;  %s3885_s26 = smov [#allocation7]  }
  0x26   :  { %s21_s25 = sshll.u32 %s3884_s24, 4  ;;  %s42_s27 = sshll.u32 %s3885_s26, 4  ;;  %s22_s25 = int_to_ptr.vmem [resolvable:$true] %s21_s25  ;;  %s3954_s27 = int_to_ptr.vmem [resolvable:$true] %s42_s27 }
  0x27   :  { %s3782_s30 = scalar_lea.hbm %s4047_s0, 1024 }
  0x28   :  { %p3783_p2 = scmp.ne.s32.totalorder %s4047_s0, %s3782_s30  ;;  %p3786_p3 = scmp.lt.u32.totalorder %s3782_s30, %s4047_s0 }
  0x2a   :  { %p3788_p4 = pnand %p3786_p3, %p3783_p2 }
  0x2c   :  { %3791 = shalt.err (!%p3788_p4)
}
  0x2d   :  { %s3792_s3 = scalar_lea.vmem %s22_s25, 1024  ;;  %p3797_p6 = scmp.lt.s32.totalorder %s22_s25, %s22_s25 }
  0x2e   :  { %p3793_p5 = scmp.ne.s32.totalorder %s22_s25, %s3792_s3  ;;  %p3798_p7 = scmp.lt.s32.totalorder %s3792_s3, %s3792_s3 }
  0x30   :  { %p3799_p8 = por %p3798_p7, %p3797_p6 }
  0x32   :  { %p3800_p9 = pnand %p3799_p8, %p3793_p5 }
  0x34   :  { %3803 = shalt.err (!%p3800_p9)
}
  0x35   :  { %24 = dma.hbm_to_vmem [thread:$0]  %s4047_s0, 1024, %s22_s25, [#allocation3]  }
  0x36   :  { %s3804_s15 = scalar_lea.hbm %s4049_s2, 8192 }
  0x37   :  { %p3805_p10 = scmp.ne.s32.totalorder %s4049_s2, %s3804_s15  ;;  %p3808_p11 = scmp.lt.u32.totalorder %s3804_s15, %s4049_s2 }
  0x39   :  { %p3810_p12 = pnand %p3808_p11, %p3805_p10 }
  0x3b   :  { %3813 = shalt.err (!%p3810_p12)
}
  0x3c   :  { %s3814_s20 = scalar_lea.vmem %s3954_s27, 8192  ;;  %p3819_p0 = scmp.lt.s32.totalorder %s3954_s27, %s3954_s27 }
  0x3d   :  { %p3815_p13 = scmp.ne.s32.totalorder %s3954_s27, %s3814_s20  ;;  %p3820_p1 = scmp.lt.s32.totalorder %s3814_s20, %s3814_s20 }
  0x3f   :  { %p3821_p2 = por %p3820_p1, %p3819_p0 }
  0x41   :  { %p3822_p3 = pnand %p3821_p2, %p3815_p13 }
  0x43   :  { %3825 = shalt.err (!%p3822_p3)
}
  0x44   :  { %s3886_s0 = smov 128   ;;  %s3887_s22 = smov 8  }
  0x45   :  { %48 = dma.hbm_to_vmem [thread:$0]  %s4049_s2, 8192, %s3954_s27, [#allocation6], %s3886_s0, %s3886_s0, %s3887_s22  }
  0x46   :  { %s3888_s25 = smov [#allocation10]   ;;  %s3826_s30 = scalar_lea.hbm %s4051_s4, 1024 }
  0x47   :  { %s66_s26 = sshll.u32 %s3888_s25, 4  ;;  %p3827_p4 = scmp.ne.s32.totalorder %s4051_s4, %s3826_s30  ;;  %s67_s26 = int_to_ptr.vmem [resolvable:$true] %s66_s26 }
  0x48   :  { %p3830_p5 = scmp.lt.u32.totalorder %s3826_s30, %s4051_s4 }
  0x4a   :  { %p3832_p6 = pnand %p3830_p5, %p3827_p4 }
  0x4c   :  { %3835 = shalt.err (!%p3832_p6)
}
  0x4d   :  { %s3836_s3 = scalar_lea.vmem %s67_s26, 1024  ;;  %p3841_p8 = scmp.lt.s32.totalorder %s67_s26, %s67_s26 }
  0x4e   :  { %p3837_p7 = scmp.ne.s32.totalorder %s67_s26, %s3836_s3  ;;  %p3842_p9 = scmp.lt.s32.totalorder %s3836_s3, %s3836_s3 }
  0x50   :  { %p3843_p10 = por %p3842_p9, %p3841_p8 }
  0x52   :  { %p3844_p11 = pnand %p3843_p10, %p3837_p7 }
  0x54   :  { %3847 = shalt.err (!%p3844_p11)
}
  0x55   :  { %72 = dma.hbm_to_vmem [thread:$0]  %s4051_s4, 1024, %s67_s26, [#allocation9], %s3882_s1, %s3882_s1, %s3883_s21  }
  0x56   :  { %3870 = dma.done.wait [#allocation3], 1024  }
  0x57   :  { %3871 = vsyncadd [#allocation3], 4294966272 }
  0x58   :  { %3872 = dma.done.wait [#allocation6], 40960  }
  0x59   :  { %3873 = vsyncadd [#allocation6], 4294926336 }
  0x5a   :  { %3874 = dma.done.wait [#allocation9], 3072  }
  0x5b   :  { %3875 = vsyncadd [#allocation9], 4294964224  ;;  %v3234_v0 = vld [vmem:[#allocation5 + $0x4] ss:$16 sps:$4 sm:$0xff]   ;;  %v3236_v1 = vld [vmem:[#allocation5 + $0xc] ss:$16 sps:$4 sm:$0xff]  }
  0x5c   :  { %1665 = vmatprep.subr.bf16.mxu0 %v3234_v0  ;;  %v3238_v2 = vld [vmem:[#allocation5] ss:$16 sps:$4 sm:$0xff]   ;;  %v3239_v3 = vld [vmem:[#allocation5 + $0x8] ss:$16 sps:$4 sm:$0xff]   ;;  %1829 = vmatprep.subr.bf16.mxu1 %v3236_v1  ;;  %v3240_v4 = vld [vmem:[#allocation5 + $0x24] ss:$16 sps:$4 sm:$0xff]  }
  0x5d   :  { %1666 = vmatpush1.bf16.msra.mxu0 %v3238_v2  ;;  %1830 = vmatpush1.bf16.msra.mxu1 %v3239_v3  ;;  %v3242_v5 = vld [vmem:[#allocation5 + $0x2c] ss:$16 sps:$4 sm:$0xff]   ;;  %v3244_v6 = vld [vmem:[#allocation5 + $0x20] ss:$16 sps:$4 sm:$0xff]   ;;  %v3245_v7 = vld [vmem:[#allocation5 + $0x28] ss:$16 sps:$4 sm:$0xff]  }
  0x5e   :  { %1667 = vmatprep.subr.bf16.mxu0 %v3240_v4  ;;  %1831 = vmatprep.subr.bf16.mxu1 %v3242_v5  ;;  %v3246_v8 = vld [vmem:[#allocation5 + $0x44] ss:$16 sps:$4 sm:$0xff]   ;;  %v3248_v9 = vld [vmem:[#allocation5 + $0x4c] ss:$16 sps:$4 sm:$0xff]   ;;  %v3250_v10 = vld [vmem:[#allocation5 + $0x40] ss:$16 sps:$4 sm:$0xff]  }
  0x5f   :  { %v3251_v11 = vld [vmem:[#allocation5 + $0x48] ss:$16 sps:$4 sm:$0xff]   ;;  %v3252_v12 = vld [vmem:[#allocation5 + $0x64] ss:$16 sps:$4 sm:$0xff]   ;;  %v3254_v13 = vld [vmem:[#allocation5 + $0x6c] ss:$16 sps:$4 sm:$0xff]  }
  0x60   :  { %v3256_v14 = vld [vmem:[#allocation5 + $0x60] ss:$16 sps:$4 sm:$0xff]   ;;  %v3257_v15 = vld [vmem:[#allocation5 + $0x68] ss:$16 sps:$4 sm:$0xff]   ;;  %v3258_v16 = vld [vmem:[#allocation5 + $0x84] ss:$16 sps:$4 sm:$0xff]  }
  0x61   :  { %1668 = vmatpush1.bf16.msra.mxu0 %v3244_v6  ;;  %1832 = vmatpush1.bf16.msra.mxu1 %v3245_v7  ;;  %v3260_v17 = vld [vmem:[#allocation5 + $0x8c] ss:$16 sps:$4 sm:$0xff]   ;;  %v3262_v18 = vld [vmem:[#allocation5 + $0x80] ss:$16 sps:$4 sm:$0xff]   ;;  %v3263_v19 = vld [vmem:[#allocation5 + $0x88] ss:$16 sps:$4 sm:$0xff]  }
  0x62   :  { %1669 = vmatprep.subr.bf16.mxu0 %v3246_v8  ;;  %1833 = vmatprep.subr.bf16.mxu1 %v3248_v9  ;;  %v3264_v20 = vld [vmem:[#allocation5 + $0xa4] ss:$16 sps:$4 sm:$0xff]   ;;  %v3266_v21 = vld [vmem:[#allocation5 + $0xac] ss:$16 sps:$4 sm:$0xff]   ;;  %v3268_v22 = vld [vmem:[#allocation5 + $0xa0] ss:$16 sps:$4 sm:$0xff]  }
  0x63   :  { %v3269_v23 = vld [vmem:[#allocation5 + $0xa8] ss:$16 sps:$4 sm:$0xff]   ;;  %v3270_v24 = vld [vmem:[#allocation5 + $0xc4] ss:$16 sps:$4 sm:$0xff]   ;;  %v3272_v25 = vld [vmem:[#allocation5 + $0xcc] ss:$16 sps:$4 sm:$0xff]  }
  0x64   :  { %v3274_v26 = vld [vmem:[#allocation5 + $0xc0] ss:$16 sps:$4 sm:$0xff]   ;;  %v3275_v27 = vld [vmem:[#allocation5 + $0xc8] ss:$16 sps:$4 sm:$0xff]   ;;  %v3276_v28 = vld [vmem:[#allocation5 + $0xe4] ss:$16 sps:$4 sm:$0xff]  }
  0x65   :  { %1670 = vmatpush1.bf16.msra.mxu0 %v3250_v10  ;;  %1834 = vmatpush1.bf16.msra.mxu1 %v3251_v11  ;;  %v3278_v29 = vld [vmem:[#allocation5 + $0xec] ss:$16 sps:$4 sm:$0xff]   ;;  %v3280_v30 = vld [vmem:[#allocation5 + $0xe0] ss:$16 sps:$4 sm:$0xff]   ;;  %v3281_v31 = vld [vmem:[#allocation5 + $0xe8] ss:$16 sps:$4 sm:$0xff]  }
  0x66   :  { %1671 = vmatprep.subr.bf16.mxu0 %v3252_v12  ;;  %1835 = vmatprep.subr.bf16.mxu1 %v3254_v13  ;;  %v3282_v32 = vld [vmem:[#allocation5 + $0x104] ss:$16 sps:$4 sm:$0xff]   ;;  %v3284_v33 = vld [vmem:[#allocation5 + $0x10c] ss:$16 sps:$4 sm:$0xff]   ;;  %v3286_v34 = vld [vmem:[#allocation5 + $0x100] ss:$16 sps:$4 sm:$0xff]  }
  0x67   :  { %v3287_v35 = vld [vmem:[#allocation5 + $0x108] ss:$16 sps:$4 sm:$0xff]   ;;  %v3288_v36 = vld [vmem:[#allocation5 + $0x124] ss:$16 sps:$4 sm:$0xff]   ;;  %v3290_v37 = vld [vmem:[#allocation5 + $0x12c] ss:$16 sps:$4 sm:$0xff]  }
  0x68   :  { %v3292_v38 = vld [vmem:[#allocation5 + $0x120] ss:$16 sps:$4 sm:$0xff]   ;;  %v3293_v39 = vld [vmem:[#allocation5 + $0x128] ss:$16 sps:$4 sm:$0xff]   ;;  %v3294_v40 = vld [vmem:[#allocation5 + $0x144] ss:$16 sps:$4 sm:$0xff]  }
  0x69   :  { %1672 = vmatpush1.bf16.msra.mxu0 %v3256_v14  ;;  %1836 = vmatpush1.bf16.msra.mxu1 %v3257_v15  ;;  %v3296_v41 = vld [vmem:[#allocation5 + $0x14c] ss:$16 sps:$4 sm:$0xff]   ;;  %v3298_v42 = vld [vmem:[#allocation5 + $0x140] ss:$16 sps:$4 sm:$0xff]   ;;  %v3299_v43 = vld [vmem:[#allocation5 + $0x148] ss:$16 sps:$4 sm:$0xff]  }
  0x6a   :  { %1673 = vmatprep.subr.bf16.mxu0 %v3258_v16  ;;  %1837 = vmatprep.subr.bf16.mxu1 %v3260_v17  ;;  %v3300_v44 = vld [vmem:[#allocation5 + $0x164] ss:$16 sps:$4 sm:$0xff]   ;;  %v3302_v45 = vld [vmem:[#allocation5 + $0x16c] ss:$16 sps:$4 sm:$0xff]   ;;  %v3304_v47 = vld [vmem:[#allocation5 + $0x160] ss:$16 sps:$4 sm:$0xff]  }
  0x6b   :  { %v92_v46 = vld [vmem:[#allocation2 + $0x8] sm:$0xff]  ;;  %v3306_v50 = vld [vmem:[#allocation5 + $0x184] ss:$16 sps:$4 sm:$0xff]   ;;  %v3310_v52 = vld [vmem:[#allocation5 + $0x180] ss:$16 sps:$4 sm:$0xff]   ;;  %vm3890_vm0 = vmmov 0  }
  0x6c   :  { %v356_v48 = vpack.c.bf16 %v92_v46, %v92_v46  ;;  %v3305_v49 = vld [vmem:[#allocation5 + $0x168] ss:$16 sps:$4 sm:$0xff]   ;;  %v3308_v51 = vld [vmem:[#allocation5 + $0x18c] ss:$16 sps:$4 sm:$0xff]   ;;  %v3312_v54 = vld [vmem:[#allocation5 + $0x1a4] ss:$16 sps:$4 sm:$0xff]  }
  0x6d   :  { %1674 = vmatpush1.bf16.msra.mxu0 %v3262_v18  ;;  %1838 = vmatpush1.bf16.msra.mxu1 %v3263_v19  ;;  %v3311_v53 = vld [vmem:[#allocation5 + $0x188] ss:$16 sps:$4 sm:$0xff]   ;;  %v3314_v55 = vld [vmem:[#allocation5 + $0x1ac] ss:$16 sps:$4 sm:$0xff]   ;;  %v3316_v56 = vld [vmem:[#allocation5 + $0x1a0] ss:$16 sps:$4 sm:$0xff]  }
  0x6e   :  { %1675 = vmatprep.subr.bf16.mxu0 %v3264_v20  ;;  %1839 = vmatprep.subr.bf16.mxu1 %v3266_v21  ;;  %v3317_v57 = vld [vmem:[#allocation5 + $0x1a8] ss:$16 sps:$4 sm:$0xff]   ;;  %v3318_v58 = vld [vmem:[#allocation5 + $0x1c4] ss:$16 sps:$4 sm:$0xff]   ;;  %v3320_v59 = vld [vmem:[#allocation5 + $0x1cc] ss:$16 sps:$4 sm:$0xff]  }
  0x6f   :  { %1697 = vmatprep.mubr.bf16.mxu0 %v356_v48  ;;  %1861 = vmatprep.mubr.bf16.mxu1 %v356_v48  ;;  %v3322_v60 = vld [vmem:[#allocation5 + $0x1c0] ss:$16 sps:$4 sm:$0xff]   ;;  %v3323_v61 = vld [vmem:[#allocation5 + $0x1c8] ss:$16 sps:$4 sm:$0xff]   ;;  %v3324_v62 = vld [vmem:[#allocation5 + $0x1e4] ss:$16 sps:$4 sm:$0xff]  }
  0x70   :  { %v3326_v63 = vld [vmem:[#allocation5 + $0x1ec] ss:$16 sps:$4 sm:$0xff]   ;;  %v3328_v0 = vld [vmem:[#allocation5 + $0x1e0] ss:$16 sps:$4 sm:$0xff]   ;;  %v3329_v1 = vld [vmem:[#allocation5 + $0x1e8] ss:$16 sps:$4 sm:$0xff]  }
  0x71   :  { %1676 = vmatpush1.bf16.msra.mxu0 %v3268_v22  ;;  %1840 = vmatpush1.bf16.msra.mxu1 %v3269_v23  ;;  %v91_v2 = vld [vmem:[#allocation2] sm:$0xff]  ;;  %v3335_v4 = vld [vmem:[#allocation5 + $0x20c] ss:$16 sps:$4 sm:$0xff]   ;;  %v3333_v7 = vld [vmem:[#allocation5 + $0x208] ss:$16 sps:$4 sm:$0xff]   ;;  %s3891_s16 = smov [#allocation11]  }
  0x72   :  { %1677 = vmatprep.subr.bf16.mxu0 %v3270_v24  ;;  %1841 = vmatprep.subr.bf16.mxu1 %v3272_v25  ;;  %v3332_v3 = vld [vmem:[#allocation5 + $0x204] ss:$16 sps:$4 sm:$0xff]   ;;  %v355_v5 = vpack.c.bf16 %v91_v2, %v91_v2  ;;  %v3330_v6 = vld [vmem:[#allocation5 + $0x200] ss:$16 sps:$4 sm:$0xff]   ;;  %v3341_v9 = vld [vmem:[#allocation5 + $0x22c] ss:$16 sps:$4 sm:$0xff]  }
  0x73   :  { %v3338_v8 = vld [vmem:[#allocation5 + $0x224] ss:$16 sps:$4 sm:$0xff]   ;;  %v3336_v10 = vld [vmem:[#allocation5 + $0x220] ss:$16 sps:$4 sm:$0xff]   ;;  %v3339_v11 = vld [vmem:[#allocation5 + $0x228] ss:$16 sps:$4 sm:$0xff]  }
  0x74   :  { %v3344_v12 = vld [vmem:[#allocation5 + $0x244] ss:$16 sps:$4 sm:$0xff]   ;;  %v3347_v13 = vld [vmem:[#allocation5 + $0x24c] ss:$16 sps:$4 sm:$0xff]   ;;  %v3342_v14 = vld [vmem:[#allocation5 + $0x240] ss:$16 sps:$4 sm:$0xff]  }
  0x75   :  { %1678 = vmatpush1.bf16.msra.mxu0 %v3274_v26  ;;  %1842 = vmatpush1.bf16.msra.mxu1 %v3275_v27  ;;  %v3345_v15 = vld [vmem:[#allocation5 + $0x248] ss:$16 sps:$4 sm:$0xff]   ;;  %v3350_v16 = vld [vmem:[#allocation5 + $0x264] ss:$16 sps:$4 sm:$0xff]   ;;  %v3353_v17 = vld [vmem:[#allocation5 + $0x26c] ss:$16 sps:$4 sm:$0xff]  }
  0x76   :  { %1679 = vmatprep.subr.bf16.mxu0 %v3276_v28  ;;  %1843 = vmatprep.subr.bf16.mxu1 %v3278_v29  ;;  %v3348_v18 = vld [vmem:[#allocation5 + $0x260] ss:$16 sps:$4 sm:$0xff]   ;;  %v3351_v19 = vld [vmem:[#allocation5 + $0x268] ss:$16 sps:$4 sm:$0xff]   ;;  %v3356_v20 = vld [vmem:[#allocation5 + $0x284] ss:$16 sps:$4 sm:$0xff]  }
  0x77   :  { %v3359_v21 = vld [vmem:[#allocation5 + $0x28c] ss:$16 sps:$4 sm:$0xff]   ;;  %v3354_v22 = vld [vmem:[#allocation5 + $0x280] ss:$16 sps:$4 sm:$0xff]   ;;  %v3357_v23 = vld [vmem:[#allocation5 + $0x288] ss:$16 sps:$4 sm:$0xff]  }
  0x78   :  { %v3362_v24 = vld [vmem:[#allocation5 + $0x2a4] ss:$16 sps:$4 sm:$0xff]   ;;  %v3365_v25 = vld [vmem:[#allocation5 + $0x2ac] ss:$16 sps:$4 sm:$0xff]   ;;  %v3360_v26 = vld [vmem:[#allocation5 + $0x2a0] ss:$16 sps:$4 sm:$0xff]  }
  0x79   :  { %1680 = vmatpush1.bf16.msra.mxu0 %v3280_v30  ;;  %1844 = vmatpush1.bf16.msra.mxu1 %v3281_v31  ;;  %v3363_v27 = vld [vmem:[#allocation5 + $0x2a8] ss:$16 sps:$4 sm:$0xff]   ;;  %v3368_v28 = vld [vmem:[#allocation5 + $0x2c4] ss:$16 sps:$4 sm:$0xff]   ;;  %v3371_v29 = vld [vmem:[#allocation5 + $0x2cc] ss:$16 sps:$4 sm:$0xff]  }
  0x7a   :  { %1681 = vmatprep.subr.bf16.mxu0 %v3282_v32  ;;  %1845 = vmatprep.subr.bf16.mxu1 %v3284_v33  ;;  %v94_v30 = vld [vmem:[#allocation2 + $0x18] sm:$0xff]  ;;  %v3366_v31 = vld [vmem:[#allocation5 + $0x2c0] ss:$16 sps:$4 sm:$0xff]   ;;  %v3392_v46 = vld [vmem:[#allocation5 + $0x344] ss:$16 sps:$4 sm:$0xff]   ;;  %s2778_s17 = sshll.u32 %s3891_s16, 4  ;;  %s2779_s17 = int_to_ptr.vmem [resolvable:$true] %s2778_s17 }
  0x7b   :  { %v358_v32 = vpack.c.bf16 %v94_v30, %v94_v30  ;;  %v3369_v33 = vld [vmem:[#allocation5 + $0x2c8] ss:$16 sps:$4 sm:$0xff]   ;;  %v3390_v48 = vld [vmem:[#allocation5 + $0x340] ss:$16 sps:$4 sm:$0xff]   ;;  %v3422_v2 = vld [vmem:[#allocation5 + $0x3e4] ss:$16 sps:$4 sm:$0xff]   ;;  %p3853_p13 = scmp.lt.s32.totalorder %s2779_s17, %s2779_s17 }
  0x7c   :  { %v3458_v30 = vld [vmem:[#allocation5 + $0x4a4] ss:$16 sps:$4 sm:$0xff]   ;;  %s3848_s18 = scalar_lea.vmem %s2779_s17, 128 }
  0x7d   :  { %1682 = vmatpush1.bf16.msra.mxu0 %v3286_v34  ;;  %1846 = vmatpush1.bf16.msra.mxu1 %v3287_v35  ;;  %v3374_v34 = vld [vmem:[#allocation5 + $0x2e4] ss:$16 sps:$4 sm:$0xff]   ;;  %v3377_v35 = vld [vmem:[#allocation5 + $0x2ec] ss:$16 sps:$4 sm:$0xff]   ;;  %p3849_p12 = scmp.ne.s32.totalorder %s2779_s17, %s3848_s18  ;;  %p3854_p0 = scmp.lt.s32.totalorder %s3848_s18, %s3848_s18 }
  0x7e   :  { %1683 = vmatprep.subr.bf16.mxu0 %v3288_v36  ;;  %1847 = vmatprep.subr.bf16.mxu1 %v3290_v37  ;;  %v3372_v36 = vld [vmem:[#allocation5 + $0x2e0] ss:$16 sps:$4 sm:$0xff]   ;;  %v3375_v37 = vld [vmem:[#allocation5 + $0x2e8] ss:$16 sps:$4 sm:$0xff]  }
  0x7f   :  { %p3855_p1 = por %p3854_p0, %p3853_p13 }
  0x81   :  { %1684 = vmatpush1.bf16.msra.mxu0 %v3292_v38  ;;  %1848 = vmatpush1.bf16.msra.mxu1 %v3293_v39  ;;  %v3380_v38 = vld [vmem:[#allocation5 + $0x304] ss:$16 sps:$4 sm:$0xff]   ;;  %v3383_v39 = vld [vmem:[#allocation5 + $0x30c] ss:$16 sps:$4 sm:$0xff]   ;;  %p3856_p2 = pnand %p3855_p1, %p3849_p12 }
  0x82   :  { %1685 = vmatprep.subr.bf16.mxu0 %v3294_v40  ;;  %1849 = vmatprep.subr.bf16.mxu1 %v3296_v41  ;;  %v3378_v40 = vld [vmem:[#allocation5 + $0x300] ss:$16 sps:$4 sm:$0xff]   ;;  %v3381_v41 = vld [vmem:[#allocation5 + $0x308] ss:$16 sps:$4 sm:$0xff]  }
  0x85   :  { %1686 = vmatpush1.bf16.msra.mxu0 %v3298_v42  ;;  %1850 = vmatpush1.bf16.msra.mxu1 %v3299_v43  ;;  %v3386_v42 = vld [vmem:[#allocation5 + $0x324] ss:$16 sps:$4 sm:$0xff]   ;;  %v3389_v43 = vld [vmem:[#allocation5 + $0x32c] ss:$16 sps:$4 sm:$0xff]  }
  0x86   :  { %1687 = vmatprep.subr.bf16.mxu0 %v3300_v44  ;;  %1851 = vmatprep.subr.bf16.mxu1 %v3302_v45  ;;  %v3384_v44 = vld [vmem:[#allocation5 + $0x320] ss:$16 sps:$4 sm:$0xff]   ;;  %v3387_v45 = vld [vmem:[#allocation5 + $0x328] ss:$16 sps:$4 sm:$0xff]  }
  0x89   :  { %1688 = vmatpush1.bf16.msra.mxu0 %v3304_v47  ;;  %1852 = vmatpush1.bf16.msra.mxu1 %v3305_v49  ;;  %v3395_v47 = vld [vmem:[#allocation5 + $0x34c] ss:$16 sps:$4 sm:$0xff]   ;;  %v3393_v49 = vld [vmem:[#allocation5 + $0x348] ss:$16 sps:$4 sm:$0xff]  }
  0x8a   :  { %1689 = vmatprep.subr.bf16.mxu0 %v3306_v50  ;;  %1853 = vmatprep.subr.bf16.mxu1 %v3308_v51  ;;  %v3398_v50 = vld [vmem:[#allocation5 + $0x364] ss:$16 sps:$4 sm:$0xff]   ;;  %v3401_v51 = vld [vmem:[#allocation5 + $0x36c] ss:$16 sps:$4 sm:$0xff]  }
  0x8d   :  { %1690 = vmatpush1.bf16.msra.mxu0 %v3310_v52  ;;  %1854 = vmatpush1.bf16.msra.mxu1 %v3311_v53  ;;  %v3396_v52 = vld [vmem:[#allocation5 + $0x360] ss:$16 sps:$4 sm:$0xff]   ;;  %v3399_v53 = vld [vmem:[#allocation5 + $0x368] ss:$16 sps:$4 sm:$0xff]  }
  0x8e   :  { %1691 = vmatprep.subr.bf16.mxu0 %v3312_v54  ;;  %1855 = vmatprep.subr.bf16.mxu1 %v3314_v55  ;;  %v3404_v54 = vld [vmem:[#allocation5 + $0x384] ss:$16 sps:$4 sm:$0xff]   ;;  %v3407_v55 = vld [vmem:[#allocation5 + $0x38c] ss:$16 sps:$4 sm:$0xff]  }
  0x91   :  { %1692 = vmatpush1.bf16.msra.mxu0 %v3316_v56  ;;  %1856 = vmatpush1.bf16.msra.mxu1 %v3317_v57  ;;  %v3402_v56 = vld [vmem:[#allocation5 + $0x380] ss:$16 sps:$4 sm:$0xff]   ;;  %v3405_v57 = vld [vmem:[#allocation5 + $0x388] ss:$16 sps:$4 sm:$0xff]  }
  0x92   :  { %1693 = vmatprep.subr.bf16.mxu0 %v3318_v58  ;;  %1857 = vmatprep.subr.bf16.mxu1 %v3320_v59  ;;  %v3410_v58 = vld [vmem:[#allocation5 + $0x3a4] ss:$16 sps:$4 sm:$0xff]   ;;  %v3413_v59 = vld [vmem:[#allocation5 + $0x3ac] ss:$16 sps:$4 sm:$0xff]  }
  0x95   :  { %1694 = vmatpush1.bf16.msra.mxu0 %v3322_v60  ;;  %1858 = vmatpush1.bf16.msra.mxu1 %v3323_v61  ;;  %v3408_v60 = vld [vmem:[#allocation5 + $0x3a0] ss:$16 sps:$4 sm:$0xff]   ;;  %v3411_v61 = vld [vmem:[#allocation5 + $0x3a8] ss:$16 sps:$4 sm:$0xff]  }
  0x96   :  { %1695 = vmatprep.subr.bf16.mxu0 %v3324_v62  ;;  %1859 = vmatprep.subr.bf16.mxu1 %v3326_v63  ;;  %v3416_v62 = vld [vmem:[#allocation5 + $0x3c4] ss:$16 sps:$4 sm:$0xff]   ;;  %v3419_v63 = vld [vmem:[#allocation5 + $0x3cc] ss:$16 sps:$4 sm:$0xff]  }
  0x99   :  { %1696 = vmatpush1.bf16.msra.mxu0 %v3328_v0  ;;  %1860 = vmatpush1.bf16.msra.mxu1 %v3329_v1  ;;  %v3414_v0 = vld [vmem:[#allocation5 + $0x3c0] ss:$16 sps:$4 sm:$0xff]   ;;  %v3417_v1 = vld [vmem:[#allocation5 + $0x3c8] ss:$16 sps:$4 sm:$0xff]  }
  0x9a   :  { %1706 = vmatprep.subr.bf16.mxu0 %v3332_v3  ;;  %1870 = vmatprep.subr.bf16.mxu1 %v3335_v4  ;;  %v3425_v3 = vld [vmem:[#allocation5 + $0x3ec] ss:$16 sps:$4 sm:$0xff]   ;;  %v3420_v4 = vld [vmem:[#allocation5 + $0x3e0] ss:$16 sps:$4 sm:$0xff]  }
  0x9c   :  { %1698 = vmatmul.mubr.bf16.vlgmr.msra.gmra.mrb[0].mxu0 %v355_v5  ;;  %1862 = vmatmul.mubr.bf16.vlgmr.msra.gmra.mrb[0].mxu1 %v355_v5  ;;  %v3423_v5 = vld [vmem:[#allocation5 + $0x3e8] ss:$16 sps:$4 sm:$0xff]  }
  0x9d   :  { %1707 = vmatpush1.bf16.msra.mxu0 %v3330_v6  ;;  %1871 = vmatpush1.bf16.msra.mxu1 %v3333_v7  ;;  %v3428_v6 = vld [vmem:[#allocation5 + $0x404] ss:$16 sps:$4 sm:$0xff]  }
  0x9e   :  { %1708 = vmatprep.subr.bf16.mxu0 %v3338_v8  ;;  %1872 = vmatprep.subr.bf16.mxu1 %v3341_v9  ;;  %v93_v7 = vld [vmem:[#allocation2 + $0x10] sm:$0xff]  ;;  %v3431_v8 = vld [vmem:[#allocation5 + $0x40c] ss:$16 sps:$4 sm:$0xff]  }
  0x9f   :  { %1738 = vmatprep.mubr.bf16.mxu0 %v358_v32  ;;  %1902 = vmatprep.mubr.bf16.mxu1 %v358_v32  ;;  %v3426_v9 = vld [vmem:[#allocation5 + $0x400] ss:$16 sps:$4 sm:$0xff]  }
  0xa0   :  { %v3456_v32 = vld [vmem:[#allocation5 + $0x4a0] ss:$16 sps:$4 sm:$0xff]  }
  0xa1   :  { %1709 = vmatpush1.bf16.msra.mxu0 %v3336_v10  ;;  %1873 = vmatpush1.bf16.msra.mxu1 %v3339_v11  ;;  %v3429_v10 = vld [vmem:[#allocation5 + $0x408] ss:$16 sps:$4 sm:$0xff]   ;;  %v357_v11 = vpack.c.bf16 %v93_v7, %v93_v7  ;;  %v3521_v7 = vld [vmem:[#allocation5 + $0x5ec] ss:$16 sps:$4 sm:$0xff]  }
  0xa2   :  { %1710 = vmatprep.subr.bf16.mxu0 %v3344_v12  ;;  %1874 = vmatprep.subr.bf16.mxu1 %v3347_v13  ;;  %v3434_v12 = vld [vmem:[#allocation5 + $0x424] ss:$16 sps:$4 sm:$0xff]   ;;  %v3437_v13 = vld [vmem:[#allocation5 + $0x42c] ss:$16 sps:$4 sm:$0xff]  }
  0xa5   :  { %1711 = vmatpush1.bf16.msra.mxu0 %v3342_v14  ;;  %1875 = vmatpush1.bf16.msra.mxu1 %v3345_v15  ;;  %v96_v14 = vld [vmem:[#allocation2 + $0x28] sm:$0xff] }
  0xa6   :  { %1712 = vmatprep.subr.bf16.mxu0 %v3350_v16  ;;  %1876 = vmatprep.subr.bf16.mxu1 %v3353_v17  ;;  %v360_v15 = vpack.c.bf16 %v96_v14, %v96_v14  ;;  %v3432_v16 = vld [vmem:[#allocation5 + $0x420] ss:$16 sps:$4 sm:$0xff]   ;;  %v3435_v17 = vld [vmem:[#allocation5 + $0x428] ss:$16 sps:$4 sm:$0xff]  }
  0xa7   :  { %v3525_v14 = vld [vmem:[#allocation5 + $0x608] ss:$16 sps:$4 sm:$0xff]  }
  0xa9   :  { %1713 = vmatpush1.bf16.msra.mxu0 %v3348_v18  ;;  %1877 = vmatpush1.bf16.msra.mxu1 %v3351_v19  ;;  %v3440_v18 = vld [vmem:[#allocation5 + $0x444] ss:$16 sps:$4 sm:$0xff]   ;;  %v3443_v19 = vld [vmem:[#allocation5 + $0x44c] ss:$16 sps:$4 sm:$0xff]  }
  0xaa   :  { %1714 = vmatprep.subr.bf16.mxu0 %v3356_v20  ;;  %1878 = vmatprep.subr.bf16.mxu1 %v3359_v21  ;;  %v3438_v20 = vld [vmem:[#allocation5 + $0x440] ss:$16 sps:$4 sm:$0xff]   ;;  %v3441_v21 = vld [vmem:[#allocation5 + $0x448] ss:$16 sps:$4 sm:$0xff]  }
  0xad   :  { %1715 = vmatpush1.bf16.msra.mxu0 %v3354_v22  ;;  %1879 = vmatpush1.bf16.msra.mxu1 %v3357_v23  ;;  %v3446_v22 = vld [vmem:[#allocation5 + $0x464] ss:$16 sps:$4 sm:$0xff]   ;;  %v3449_v23 = vld [vmem:[#allocation5 + $0x46c] ss:$16 sps:$4 sm:$0xff]  }
  0xae   :  { %1716 = vmatprep.subr.bf16.mxu0 %v3362_v24  ;;  %1880 = vmatprep.subr.bf16.mxu1 %v3365_v25  ;;  %v3444_v24 = vld [vmem:[#allocation5 + $0x460] ss:$16 sps:$4 sm:$0xff]   ;;  %v3447_v25 = vld [vmem:[#allocation5 + $0x468] ss:$16 sps:$4 sm:$0xff]  }
  0xb1   :  { %1717 = vmatpush1.bf16.msra.mxu0 %v3360_v26  ;;  %1881 = vmatpush1.bf16.msra.mxu1 %v3363_v27  ;;  %v3452_v26 = vld [vmem:[#allocation5 + $0x484] ss:$16 sps:$4 sm:$0xff]   ;;  %v3455_v27 = vld [vmem:[#allocation5 + $0x48c] ss:$16 sps:$4 sm:$0xff]  }
  0xb2   :  { %1718 = vmatprep.subr.bf16.mxu0 %v3368_v28  ;;  %1882 = vmatprep.subr.bf16.mxu1 %v3371_v29  ;;  %v3450_v28 = vld [vmem:[#allocation5 + $0x480] ss:$16 sps:$4 sm:$0xff]   ;;  %v3453_v29 = vld [vmem:[#allocation5 + $0x488] ss:$16 sps:$4 sm:$0xff]  }
  0xb5   :  { %1719 = vmatpush1.bf16.msra.mxu0 %v3366_v31  ;;  %1883 = vmatpush1.bf16.msra.mxu1 %v3369_v33  ;;  %v3461_v31 = vld [vmem:[#allocation5 + $0x4ac] ss:$16 sps:$4 sm:$0xff]   ;;  %v3459_v33 = vld [vmem:[#allocation5 + $0x4a8] ss:$16 sps:$4 sm:$0xff]  }
  0xb6   :  { %1720 = vmatprep.subr.bf16.mxu0 %v3374_v34  ;;  %1884 = vmatprep.subr.bf16.mxu1 %v3377_v35  ;;  %v3464_v34 = vld [vmem:[#allocation5 + $0x4c4] ss:$16 sps:$4 sm:$0xff]   ;;  %v3467_v35 = vld [vmem:[#allocation5 + $0x4cc] ss:$16 sps:$4 sm:$0xff]  }
  0xb9   :  { %1721 = vmatpush1.bf16.msra.mxu0 %v3372_v36  ;;  %1885 = vmatpush1.bf16.msra.mxu1 %v3375_v37  ;;  %v3462_v36 = vld [vmem:[#allocation5 + $0x4c0] ss:$16 sps:$4 sm:$0xff]   ;;  %v3465_v37 = vld [vmem:[#allocation5 + $0x4c8] ss:$16 sps:$4 sm:$0xff]  }
  0xba   :  { %1722 = vmatprep.subr.bf16.mxu0 %v3380_v38  ;;  %1886 = vmatprep.subr.bf16.mxu1 %v3383_v39  ;;  %v3470_v38 = vld [vmem:[#allocation5 + $0x4e4] ss:$16 sps:$4 sm:$0xff]   ;;  %v3473_v39 = vld [vmem:[#allocation5 + $0x4ec] ss:$16 sps:$4 sm:$0xff]  }
  0xbd   :  { %1723 = vmatpush1.bf16.msra.mxu0 %v3378_v40  ;;  %1887 = vmatpush1.bf16.msra.mxu1 %v3381_v41  ;;  %v3468_v40 = vld [vmem:[#allocation5 + $0x4e0] ss:$16 sps:$4 sm:$0xff]   ;;  %v3471_v41 = vld [vmem:[#allocation5 + $0x4e8] ss:$16 sps:$4 sm:$0xff]  }
  0xbe   :  { %1724 = vmatprep.subr.bf16.mxu0 %v3386_v42  ;;  %1888 = vmatprep.subr.bf16.mxu1 %v3389_v43  ;;  %v3476_v42 = vld [vmem:[#allocation5 + $0x504] ss:$16 sps:$4 sm:$0xff]   ;;  %v3479_v43 = vld [vmem:[#allocation5 + $0x50c] ss:$16 sps:$4 sm:$0xff]  }
  0xc1   :  { %1725 = vmatpush1.bf16.msra.mxu0 %v3384_v44  ;;  %1889 = vmatpush1.bf16.msra.mxu1 %v3387_v45  ;;  %v3474_v44 = vld [vmem:[#allocation5 + $0x500] ss:$16 sps:$4 sm:$0xff]   ;;  %v3477_v45 = vld [vmem:[#allocation5 + $0x508] ss:$16 sps:$4 sm:$0xff]  }
  0xc2   :  { %1726 = vmatprep.subr.bf16.mxu0 %v3392_v46  ;;  %1890 = vmatprep.subr.bf16.mxu1 %v3395_v47  ;;  %v3482_v46 = vld [vmem:[#allocation5 + $0x524] ss:$16 sps:$4 sm:$0xff]   ;;  %v3485_v47 = vld [vmem:[#allocation5 + $0x52c] ss:$16 sps:$4 sm:$0xff]  }
  0xc5   :  { %1727 = vmatpush1.bf16.msra.mxu0 %v3390_v48  ;;  %1891 = vmatpush1.bf16.msra.mxu1 %v3393_v49  ;;  %v3480_v48 = vld [vmem:[#allocation5 + $0x520] ss:$16 sps:$4 sm:$0xff]   ;;  %v3483_v49 = vld [vmem:[#allocation5 + $0x528] ss:$16 sps:$4 sm:$0xff]  }
  0xc6   :  { %1728 = vmatprep.subr.bf16.mxu0 %v3398_v50  ;;  %1892 = vmatprep.subr.bf16.mxu1 %v3401_v51  ;;  %v3488_v50 = vld [vmem:[#allocation5 + $0x544] ss:$16 sps:$4 sm:$0xff]   ;;  %v3491_v51 = vld [vmem:[#allocation5 + $0x54c] ss:$16 sps:$4 sm:$0xff]  }
  0xc9   :  { %1729 = vmatpush1.bf16.msra.mxu0 %v3396_v52  ;;  %1893 = vmatpush1.bf16.msra.mxu1 %v3399_v53  ;;  %v3486_v52 = vld [vmem:[#allocation5 + $0x540] ss:$16 sps:$4 sm:$0xff]   ;;  %v3489_v53 = vld [vmem:[#allocation5 + $0x548] ss:$16 sps:$4 sm:$0xff]  }
  0xca   :  { %1730 = vmatprep.subr.bf16.mxu0 %v3404_v54  ;;  %1894 = vmatprep.subr.bf16.mxu1 %v3407_v55  ;;  %v3494_v54 = vld [vmem:[#allocation5 + $0x564] ss:$16 sps:$4 sm:$0xff]   ;;  %v3497_v55 = vld [vmem:[#allocation5 + $0x56c] ss:$16 sps:$4 sm:$0xff]  }
  0xcd   :  { %1731 = vmatpush1.bf16.msra.mxu0 %v3402_v56  ;;  %1895 = vmatpush1.bf16.msra.mxu1 %v3405_v57  ;;  %v3492_v56 = vld [vmem:[#allocation5 + $0x560] ss:$16 sps:$4 sm:$0xff]   ;;  %v3495_v57 = vld [vmem:[#allocation5 + $0x568] ss:$16 sps:$4 sm:$0xff]  }
  0xce   :  { %1732 = vmatprep.subr.bf16.mxu0 %v3410_v58  ;;  %1896 = vmatprep.subr.bf16.mxu1 %v3413_v59  ;;  %v3500_v58 = vld [vmem:[#allocation5 + $0x584] ss:$16 sps:$4 sm:$0xff]   ;;  %v3503_v59 = vld [vmem:[#allocation5 + $0x58c] ss:$16 sps:$4 sm:$0xff]  }
  0xd1   :  { %1733 = vmatpush1.bf16.msra.mxu0 %v3408_v60  ;;  %1897 = vmatpush1.bf16.msra.mxu1 %v3411_v61  ;;  %v3498_v60 = vld [vmem:[#allocation5 + $0x580] ss:$16 sps:$4 sm:$0xff]   ;;  %v3501_v61 = vld [vmem:[#allocation5 + $0x588] ss:$16 sps:$4 sm:$0xff]  }
  0xd2   :  { %1734 = vmatprep.subr.bf16.mxu0 %v3416_v62  ;;  %1898 = vmatprep.subr.bf16.mxu1 %v3419_v63  ;;  %v3506_v62 = vld [vmem:[#allocation5 + $0x5a4] ss:$16 sps:$4 sm:$0xff]   ;;  %v3509_v63 = vld [vmem:[#allocation5 + $0x5ac] ss:$16 sps:$4 sm:$0xff]  }
  0xd5   :  { %1735 = vmatpush1.bf16.msra.mxu0 %v3414_v0  ;;  %1899 = vmatpush1.bf16.msra.mxu1 %v3417_v1  ;;  %v3504_v0 = vld [vmem:[#allocation5 + $0x5a0] ss:$16 sps:$4 sm:$0xff]   ;;  %v3507_v1 = vld [vmem:[#allocation5 + $0x5a8] ss:$16 sps:$4 sm:$0xff]  }
  0xd6   :  { %1736 = vmatprep.subr.bf16.mxu0 %v3422_v2  ;;  %1900 = vmatprep.subr.bf16.mxu1 %v3425_v3  ;;  %v3512_v2 = vld [vmem:[#allocation5 + $0x5c4] ss:$16 sps:$4 sm:$0xff]   ;;  %v3515_v3 = vld [vmem:[#allocation5 + $0x5cc] ss:$16 sps:$4 sm:$0xff]  }
  0xd9   :  { %1737 = vmatpush1.bf16.msra.mxu0 %v3420_v4  ;;  %1901 = vmatpush1.bf16.msra.mxu1 %v3423_v5  ;;  %v3510_v4 = vld [vmem:[#allocation5 + $0x5c0] ss:$16 sps:$4 sm:$0xff]   ;;  %v3513_v5 = vld [vmem:[#allocation5 + $0x5c8] ss:$16 sps:$4 sm:$0xff]  }
  0xda   :  { %1747 = vmatprep.subr.bf16.mxu0 %v3428_v6  ;;  %1911 = vmatprep.subr.bf16.mxu1 %v3431_v8  ;;  %v3518_v6 = vld [vmem:[#allocation5 + $0x5e4] ss:$16 sps:$4 sm:$0xff]   ;;  %v3516_v8 = vld [vmem:[#allocation5 + $0x5e0] ss:$16 sps:$4 sm:$0xff]  }
  0xdc   :  { %1739 = vmatmul.mubr.bf16.vlgmr.msra.gmra.mrb[0].mxu0 %v357_v11  ;;  %1903 = vmatmul.mubr.bf16.vlgmr.msra.gmra.mrb[0].mxu1 %v357_v11  ;;  %v95_v11 = vld [vmem:[#allocation2 + $0x20] sm:$0xff] }
  0xdd   :  { %1748 = vmatpush1.bf16.msra.mxu0 %v3426_v9  ;;  %1912 = vmatpush1.bf16.msra.mxu1 %v3429_v10  ;;  %v3519_v9 = vld [vmem:[#allocation5 + $0x5e8] ss:$16 sps:$4 sm:$0xff]   ;;  %v3524_v10 = vld [vmem:[#allocation5 + $0x604] ss:$16 sps:$4 sm:$0xff]  }
  0xde   :  { %1749 = vmatprep.subr.bf16.mxu0 %v3434_v12  ;;  %1913 = vmatprep.subr.bf16.mxu1 %v3437_v13  ;;  %v3527_v12 = vld [vmem:[#allocation5 + $0x60c] ss:$16 sps:$4 sm:$0xff]   ;;  %v3522_v13 = vld [vmem:[#allocation5 + $0x600] ss:$16 sps:$4 sm:$0xff]  }
  0xdf   :  { %1779 = vmatprep.mubr.bf16.mxu0 %v360_v15  ;;  %1943 = vmatprep.mubr.bf16.mxu1 %v360_v15  ;;  %v359_v15 = vpack.c.bf16 %v95_v11, %v95_v11  ;;  %v3617_v11 = vld [vmem:[#allocation5 + $0x7ec] ss:$16 sps:$4 sm:$0xff]  }
  0xe1   :  { %1750 = vmatpush1.bf16.msra.mxu0 %v3432_v16  ;;  %1914 = vmatpush1.bf16.msra.mxu1 %v3435_v17  ;;  %v3530_v16 = vld [vmem:[#allocation5 + $0x624] ss:$16 sps:$4 sm:$0xff]   ;;  %v98_v17 = vld [vmem:[#allocation2 + $0x38] sm:$0xff] }
  0xe2   :  { %1751 = vmatprep.subr.bf16.mxu0 %v3440_v18  ;;  %1915 = vmatprep.subr.bf16.mxu1 %v3443_v19  ;;  %v3533_v18 = vld [vmem:[#allocation5 + $0x62c] ss:$16 sps:$4 sm:$0xff]   ;;  %v3528_v19 = vld [vmem:[#allocation5 + $0x620] ss:$16 sps:$4 sm:$0xff]  }
  0xe5   :  { %1752 = vmatpush1.bf16.msra.mxu0 %v3438_v20  ;;  %1916 = vmatpush1.bf16.msra.mxu1 %v3441_v21  ;;  %v3531_v20 = vld [vmem:[#allocation5 + $0x628] ss:$16 sps:$4 sm:$0xff]   ;;  %v362_v21 = vpack.c.bf16 %v98_v17, %v98_v17 }
  0xe6   :  { %1753 = vmatprep.subr.bf16.mxu0 %v3446_v22  ;;  %1917 = vmatprep.subr.bf16.mxu1 %v3449_v23  ;;  %v3536_v22 = vld [vmem:[#allocation5 + $0x644] ss:$16 sps:$4 sm:$0xff]   ;;  %v3539_v23 = vld [vmem:[#allocation5 + $0x64c] ss:$16 sps:$4 sm:$0xff]   ;;  %v3618_v17 = vld [vmem:[#allocation7] ss:$8 sps:$4 sm:$0xff]  }
  0xe9   :  { %1754 = vmatpush1.bf16.msra.mxu0 %v3444_v24  ;;  %1918 = vmatpush1.bf16.msra.mxu1 %v3447_v25  ;;  %v3534_v24 = vld [vmem:[#allocation5 + $0x640] ss:$16 sps:$4 sm:$0xff]   ;;  %v3537_v25 = vld [vmem:[#allocation5 + $0x648] ss:$16 sps:$4 sm:$0xff]  }
  0xea   :  { %1755 = vmatprep.subr.bf16.mxu0 %v3452_v26  ;;  %1919 = vmatprep.subr.bf16.mxu1 %v3455_v27  ;;  %v3542_v26 = vld [vmem:[#allocation5 + $0x664] ss:$16 sps:$4 sm:$0xff]   ;;  %v3545_v27 = vld [vmem:[#allocation5 + $0x66c] ss:$16 sps:$4 sm:$0xff]  }
  0xed   :  { %1756 = vmatpush1.bf16.msra.mxu0 %v3450_v28  ;;  %1920 = vmatpush1.bf16.msra.mxu1 %v3453_v29  ;;  %v3540_v28 = vld [vmem:[#allocation5 + $0x660] ss:$16 sps:$4 sm:$0xff]   ;;  %v3543_v29 = vld [vmem:[#allocation5 + $0x668] ss:$16 sps:$4 sm:$0xff]  }
  0xee   :  { %1757 = vmatprep.subr.bf16.mxu0 %v3458_v30  ;;  %1921 = vmatprep.subr.bf16.mxu1 %v3461_v31  ;;  %v3548_v30 = vld [vmem:[#allocation5 + $0x684] ss:$16 sps:$4 sm:$0xff]   ;;  %v3551_v31 = vld [vmem:[#allocation5 + $0x68c] ss:$16 sps:$4 sm:$0xff]  }
  0xf1   :  { %1758 = vmatpush1.bf16.msra.mxu0 %v3456_v32  ;;  %1922 = vmatpush1.bf16.msra.mxu1 %v3459_v33  ;;  %v3546_v32 = vld [vmem:[#allocation5 + $0x680] ss:$16 sps:$4 sm:$0xff]   ;;  %v3549_v33 = vld [vmem:[#allocation5 + $0x688] ss:$16 sps:$4 sm:$0xff]  }
  0xf2   :  { %1759 = vmatprep.subr.bf16.mxu0 %v3464_v34  ;;  %1923 = vmatprep.subr.bf16.mxu1 %v3467_v35  ;;  %v3554_v34 = vld [vmem:[#allocation5 + $0x6a4] ss:$16 sps:$4 sm:$0xff]   ;;  %v3557_v35 = vld [vmem:[#allocation5 + $0x6ac] ss:$16 sps:$4 sm:$0xff]  }
  0xf5   :  { %1760 = vmatpush1.bf16.msra.mxu0 %v3462_v36  ;;  %1924 = vmatpush1.bf16.msra.mxu1 %v3465_v37  ;;  %v3552_v36 = vld [vmem:[#allocation5 + $0x6a0] ss:$16 sps:$4 sm:$0xff]   ;;  %v3555_v37 = vld [vmem:[#allocation5 + $0x6a8] ss:$16 sps:$4 sm:$0xff]  }
  0xf6   :  { %1761 = vmatprep.subr.bf16.mxu0 %v3470_v38  ;;  %1925 = vmatprep.subr.bf16.mxu1 %v3473_v39  ;;  %v3560_v38 = vld [vmem:[#allocation5 + $0x6c4] ss:$16 sps:$4 sm:$0xff]   ;;  %v3563_v39 = vld [vmem:[#allocation5 + $0x6cc] ss:$16 sps:$4 sm:$0xff]  }
  0xf9   :  { %1762 = vmatpush1.bf16.msra.mxu0 %v3468_v40  ;;  %1926 = vmatpush1.bf16.msra.mxu1 %v3471_v41  ;;  %v3558_v40 = vld [vmem:[#allocation5 + $0x6c0] ss:$16 sps:$4 sm:$0xff]   ;;  %v3561_v41 = vld [vmem:[#allocation5 + $0x6c8] ss:$16 sps:$4 sm:$0xff]  }
  0xfa   :  { %1763 = vmatprep.subr.bf16.mxu0 %v3476_v42  ;;  %1927 = vmatprep.subr.bf16.mxu1 %v3479_v43  ;;  %v3566_v42 = vld [vmem:[#allocation5 + $0x6e4] ss:$16 sps:$4 sm:$0xff]   ;;  %v3569_v43 = vld [vmem:[#allocation5 + $0x6ec] ss:$16 sps:$4 sm:$0xff]  }
  0xfd   :  { %1764 = vmatpush1.bf16.msra.mxu0 %v3474_v44  ;;  %1928 = vmatpush1.bf16.msra.mxu1 %v3477_v45  ;;  %v3564_v44 = vld [vmem:[#allocation5 + $0x6e0] ss:$16 sps:$4 sm:$0xff]   ;;  %v3567_v45 = vld [vmem:[#allocation5 + $0x6e8] ss:$16 sps:$4 sm:$0xff]  }
  0xfe   :  { %1765 = vmatprep.subr.bf16.mxu0 %v3482_v46  ;;  %1929 = vmatprep.subr.bf16.mxu1 %v3485_v47  ;;  %v3572_v46 = vld [vmem:[#allocation5 + $0x704] ss:$16 sps:$4 sm:$0xff]   ;;  %v3575_v47 = vld [vmem:[#allocation5 + $0x70c] ss:$16 sps:$4 sm:$0xff]  }
 0x101   :  { %1766 = vmatpush1.bf16.msra.mxu0 %v3480_v48  ;;  %1930 = vmatpush1.bf16.msra.mxu1 %v3483_v49  ;;  %v3570_v48 = vld [vmem:[#allocation5 + $0x700] ss:$16 sps:$4 sm:$0xff]   ;;  %v3573_v49 = vld [vmem:[#allocation5 + $0x708] ss:$16 sps:$4 sm:$0xff]  }
 0x102   :  { %1767 = vmatprep.subr.bf16.mxu0 %v3488_v50  ;;  %1931 = vmatprep.subr.bf16.mxu1 %v3491_v51  ;;  %v3578_v50 = vld [vmem:[#allocation5 + $0x724] ss:$16 sps:$4 sm:$0xff]   ;;  %v3581_v51 = vld [vmem:[#allocation5 + $0x72c] ss:$16 sps:$4 sm:$0xff]  }
 0x105   :  { %1768 = vmatpush1.bf16.msra.mxu0 %v3486_v52  ;;  %1932 = vmatpush1.bf16.msra.mxu1 %v3489_v53  ;;  %v3576_v52 = vld [vmem:[#allocation5 + $0x720] ss:$16 sps:$4 sm:$0xff]   ;;  %v3579_v53 = vld [vmem:[#allocation5 + $0x728] ss:$16 sps:$4 sm:$0xff]  }
 0x106   :  { %1769 = vmatprep.subr.bf16.mxu0 %v3494_v54  ;;  %1933 = vmatprep.subr.bf16.mxu1 %v3497_v55  ;;  %v3584_v54 = vld [vmem:[#allocation5 + $0x744] ss:$16 sps:$4 sm:$0xff]   ;;  %v3587_v55 = vld [vmem:[#allocation5 + $0x74c] ss:$16 sps:$4 sm:$0xff]  }
 0x109   :  { %1770 = vmatpush1.bf16.msra.mxu0 %v3492_v56  ;;  %1934 = vmatpush1.bf16.msra.mxu1 %v3495_v57  ;;  %v3582_v56 = vld [vmem:[#allocation5 + $0x740] ss:$16 sps:$4 sm:$0xff]   ;;  %v3585_v57 = vld [vmem:[#allocation5 + $0x748] ss:$16 sps:$4 sm:$0xff]  }
 0x10a   :  { %1771 = vmatprep.subr.bf16.mxu0 %v3500_v58  ;;  %1935 = vmatprep.subr.bf16.mxu1 %v3503_v59  ;;  %v3590_v58 = vld [vmem:[#allocation5 + $0x764] ss:$16 sps:$4 sm:$0xff]   ;;  %v3593_v59 = vld [vmem:[#allocation5 + $0x76c] ss:$16 sps:$4 sm:$0xff]  }
 0x10d   :  { %1772 = vmatpush1.bf16.msra.mxu0 %v3498_v60  ;;  %1936 = vmatpush1.bf16.msra.mxu1 %v3501_v61  ;;  %v3588_v60 = vld [vmem:[#allocation5 + $0x760] ss:$16 sps:$4 sm:$0xff]   ;;  %v3591_v61 = vld [vmem:[#allocation5 + $0x768] ss:$16 sps:$4 sm:$0xff]  }
 0x10e   :  { %1773 = vmatprep.subr.bf16.mxu0 %v3506_v62  ;;  %1937 = vmatprep.subr.bf16.mxu1 %v3509_v63  ;;  %v3596_v62 = vld [vmem:[#allocation5 + $0x784] ss:$16 sps:$4 sm:$0xff]   ;;  %v3599_v63 = vld [vmem:[#allocation5 + $0x78c] ss:$16 sps:$4 sm:$0xff]  }
 0x111   :  { %1774 = vmatpush1.bf16.msra.mxu0 %v3504_v0  ;;  %1938 = vmatpush1.bf16.msra.mxu1 %v3507_v1  ;;  %v3594_v0 = vld [vmem:[#allocation5 + $0x780] ss:$16 sps:$4 sm:$0xff]   ;;  %v3597_v1 = vld [vmem:[#allocation5 + $0x788] ss:$16 sps:$4 sm:$0xff]  }
 0x112   :  { %1775 = vmatprep.subr.bf16.mxu0 %v3512_v2  ;;  %1939 = vmatprep.subr.bf16.mxu1 %v3515_v3  ;;  %v3602_v2 = vld [vmem:[#allocation5 + $0x7a4] ss:$16 sps:$4 sm:$0xff]   ;;  %v3605_v3 = vld [vmem:[#allocation5 + $0x7ac] ss:$16 sps:$4 sm:$0xff]  }
 0x115   :  { %1776 = vmatpush1.bf16.msra.mxu0 %v3510_v4  ;;  %1940 = vmatpush1.bf16.msra.mxu1 %v3513_v5  ;;  %v3600_v4 = vld [vmem:[#allocation5 + $0x7a0] ss:$16 sps:$4 sm:$0xff]   ;;  %v3603_v5 = vld [vmem:[#allocation5 + $0x7a8] ss:$16 sps:$4 sm:$0xff]  }
 0x116   :  { %1777 = vmatprep.subr.bf16.mxu0 %v3518_v6  ;;  %1941 = vmatprep.subr.bf16.mxu1 %v3521_v7  ;;  %v3608_v6 = vld [vmem:[#allocation5 + $0x7c4] ss:$16 sps:$4 sm:$0xff]   ;;  %v3611_v7 = vld [vmem:[#allocation5 + $0x7cc] ss:$16 sps:$4 sm:$0xff]  }
 0x119   :  { %1778 = vmatpush1.bf16.msra.mxu0 %v3516_v8  ;;  %1942 = vmatpush1.bf16.msra.mxu1 %v3519_v9  ;;  %v3606_v8 = vld [vmem:[#allocation5 + $0x7c0] ss:$16 sps:$4 sm:$0xff]   ;;  %v3609_v9 = vld [vmem:[#allocation5 + $0x7c8] ss:$16 sps:$4 sm:$0xff]  }
 0x11a   :  { %1788 = vmatprep.subr.bf16.mxu0 %v3524_v10  ;;  %1952 = vmatprep.subr.bf16.mxu1 %v3527_v12  ;;  %v3614_v10 = vld [vmem:[#allocation5 + $0x7e4] ss:$16 sps:$4 sm:$0xff]   ;;  %v3612_v12 = vld [vmem:[#allocation5 + $0x7e0] ss:$16 sps:$4 sm:$0xff]  }
 0x11c   :  { %1780 = vmatmul.mubr.bf16.vlgmr.msra.gmra.mrb[0].mxu0 %v359_v15  ;;  %1944 = vmatmul.mubr.bf16.vlgmr.msra.gmra.mrb[0].mxu1 %v359_v15  ;;  %v3620_v15 = vld [vmem:[#allocation7 + $0x4] ss:$8 sps:$4 sm:$0xff]  }
 0x11d   :  { %1789 = vmatpush1.bf16.msra.mxu0 %v3522_v13  ;;  %1953 = vmatpush1.bf16.msra.mxu1 %v3525_v14  ;;  %v3615_v13 = vld [vmem:[#allocation5 + $0x7e8] ss:$16 sps:$4 sm:$0xff]   ;;  %v97_v14 = vld [vmem:[#allocation2 + $0x30] sm:$0xff] }
 0x11e   :  { %1790 = vmatprep.subr.bf16.mxu0 %v3530_v16  ;;  %1954 = vmatprep.subr.bf16.mxu1 %v3533_v18  ;;  %v361_v16 = vpack.c.bf16 %v97_v14, %v97_v14  ;;  %v3623_v18 = vld [vmem:[#allocation7 + $0x14] ss:$8 sps:$4 sm:$0xff]  }
 0x11f   :  { %1820 = vmatprep.mubr.bf16.mxu0 %v362_v21  ;;  %1984 = vmatprep.mubr.bf16.mxu1 %v362_v21  ;;  %v3624_v21 = vld [vmem:[#allocation7 + $0x20] ss:$8 sps:$4 sm:$0xff]  }
 0x121   :  { %1791 = vmatpush1.bf16.msra.mxu0 %v3528_v19  ;;  %1955 = vmatpush1.bf16.msra.mxu1 %v3531_v20  ;;  %v3621_v19 = vld [vmem:[#allocation7 + $0x10] ss:$8 sps:$4 sm:$0xff]   ;;  %v3626_v20 = vld [vmem:[#allocation7 + $0x24] ss:$8 sps:$4 sm:$0xff]  }
 0x122   :  { %1792 = vmatprep.subr.bf16.mxu0 %v3536_v22  ;;  %1956 = vmatprep.subr.bf16.mxu1 %v3539_v23  ;;  %v3629_v22 = vld [vmem:[#allocation7 + $0x34] ss:$8 sps:$4 sm:$0xff]   ;;  %v3627_v23 = vld [vmem:[#allocation7 + $0x30] ss:$8 sps:$4 sm:$0xff]  }
 0x125   :  { %1793 = vmatpush1.bf16.msra.mxu0 %v3534_v24  ;;  %1957 = vmatpush1.bf16.msra.mxu1 %v3537_v25  ;;  %v3632_v24 = vld [vmem:[#allocation7 + $0x44] ss:$8 sps:$4 sm:$0xff]   ;;  %v3630_v25 = vld [vmem:[#allocation7 + $0x40] ss:$8 sps:$4 sm:$0xff]  }
 0x126   :  { %1794 = vmatprep.subr.bf16.mxu0 %v3542_v26  ;;  %1958 = vmatprep.subr.bf16.mxu1 %v3545_v27  ;;  %v3635_v26 = vld [vmem:[#allocation7 + $0x54] ss:$8 sps:$4 sm:$0xff]   ;;  %v3633_v27 = vld [vmem:[#allocation7 + $0x50] ss:$8 sps:$4 sm:$0xff]  }
 0x129   :  { %1795 = vmatpush1.bf16.msra.mxu0 %v3540_v28  ;;  %1959 = vmatpush1.bf16.msra.mxu1 %v3543_v29  ;;  %v3638_v28 = vld [vmem:[#allocation7 + $0x64] ss:$8 sps:$4 sm:$0xff]   ;;  %v3636_v29 = vld [vmem:[#allocation7 + $0x60] ss:$8 sps:$4 sm:$0xff]  }
 0x12a   :  { %1796 = vmatprep.subr.bf16.mxu0 %v3548_v30  ;;  %1960 = vmatprep.subr.bf16.mxu1 %v3551_v31  ;;  %v3641_v30 = vld [vmem:[#allocation7 + $0x74] ss:$8 sps:$4 sm:$0xff]   ;;  %v3639_v31 = vld [vmem:[#allocation7 + $0x70] ss:$8 sps:$4 sm:$0xff]  }
 0x12d   :  { %1797 = vmatpush1.bf16.msra.mxu0 %v3546_v32  ;;  %1961 = vmatpush1.bf16.msra.mxu1 %v3549_v33  ;;  %v3644_v32 = vld [vmem:[#allocation7 + $0x84] ss:$8 sps:$4 sm:$0xff]   ;;  %v3642_v33 = vld [vmem:[#allocation7 + $0x80] ss:$8 sps:$4 sm:$0xff]  }
 0x12e   :  { %1798 = vmatprep.subr.bf16.mxu0 %v3554_v34  ;;  %1962 = vmatprep.subr.bf16.mxu1 %v3557_v35  ;;  %v3647_v34 = vld [vmem:[#allocation7 + $0x94] ss:$8 sps:$4 sm:$0xff]   ;;  %v3645_v35 = vld [vmem:[#allocation7 + $0x90] ss:$8 sps:$4 sm:$0xff]  }
 0x131   :  { %1799 = vmatpush1.bf16.msra.mxu0 %v3552_v36  ;;  %1963 = vmatpush1.bf16.msra.mxu1 %v3555_v37  ;;  %v3650_v36 = vld [vmem:[#allocation7 + $0xa4] ss:$8 sps:$4 sm:$0xff]   ;;  %v3648_v37 = vld [vmem:[#allocation7 + $0xa0] ss:$8 sps:$4 sm:$0xff]  }
 0x132   :  { %1800 = vmatprep.subr.bf16.mxu0 %v3560_v38  ;;  %1964 = vmatprep.subr.bf16.mxu1 %v3563_v39  ;;  %v3653_v38 = vld [vmem:[#allocation7 + $0xb4] ss:$8 sps:$4 sm:$0xff]   ;;  %v3651_v39 = vld [vmem:[#allocation7 + $0xb0] ss:$8 sps:$4 sm:$0xff]  }
 0x135   :  { %1801 = vmatpush1.bf16.msra.mxu0 %v3558_v40  ;;  %1965 = vmatpush1.bf16.msra.mxu1 %v3561_v41  ;;  %v3656_v40 = vld [vmem:[#allocation7 + $0xc4] ss:$8 sps:$4 sm:$0xff]   ;;  %v3654_v41 = vld [vmem:[#allocation7 + $0xc0] ss:$8 sps:$4 sm:$0xff]  }
 0x136   :  { %1802 = vmatprep.subr.bf16.mxu0 %v3566_v42  ;;  %1966 = vmatprep.subr.bf16.mxu1 %v3569_v43  ;;  %v3659_v42 = vld [vmem:[#allocation7 + $0xd4] ss:$8 sps:$4 sm:$0xff]   ;;  %v3657_v43 = vld [vmem:[#allocation7 + $0xd0] ss:$8 sps:$4 sm:$0xff]  }
 0x139   :  { %1803 = vmatpush1.bf16.msra.mxu0 %v3564_v44  ;;  %1967 = vmatpush1.bf16.msra.mxu1 %v3567_v45  ;;  %v3662_v44 = vld [vmem:[#allocation7 + $0xe4] ss:$8 sps:$4 sm:$0xff]   ;;  %v3660_v45 = vld [vmem:[#allocation7 + $0xe0] ss:$8 sps:$4 sm:$0xff]  }
 0x13a   :  { %1804 = vmatprep.subr.bf16.mxu0 %v3572_v46  ;;  %1968 = vmatprep.subr.bf16.mxu1 %v3575_v47  ;;  %v3665_v46 = vld [vmem:[#allocation7 + $0xf4] ss:$8 sps:$4 sm:$0xff]   ;;  %v3663_v47 = vld [vmem:[#allocation7 + $0xf0] ss:$8 sps:$4 sm:$0xff]  }
 0x13d   :  { %1805 = vmatpush1.bf16.msra.mxu0 %v3570_v48  ;;  %1969 = vmatpush1.bf16.msra.mxu1 %v3573_v49  ;;  %v3668_v48 = vld [vmem:[#allocation7 + $0x104] ss:$8 sps:$4 sm:$0xff]  }
 0x13e   :  { %1806 = vmatprep.subr.bf16.mxu0 %v3578_v50  ;;  %1970 = vmatprep.subr.bf16.mxu1 %v3581_v51  ;;  %v3714_v49 = vld [vmem:[#allocation8 + $0x40] sm:$0xff]   ;;  %v3716_v51 = vld [vmem:[#allocation8 + $0x48] sm:$0xff]  }
 0x13f   :  { %v3715_v50 = vld [vmem:[#allocation8] sm:$0xff]  }
 0x141   :  { %1807 = vmatpush1.bf16.msra.mxu0 %v3576_v52  ;;  %1971 = vmatpush1.bf16.msra.mxu1 %v3579_v53  ;;  %v3717_v52 = vld [vmem:[#allocation8 + $0x8] sm:$0xff]   ;;  %v3718_v53 = vld [vmem:[#allocation8 + $0x50] sm:$0xff]  }
 0x142   :  { %1808 = vmatprep.subr.bf16.mxu0 %v3584_v54  ;;  %1972 = vmatprep.subr.bf16.mxu1 %v3587_v55  ;;  %v3719_v54 = vld [vmem:[#allocation8 + $0x10] sm:$0xff]   ;;  %v3720_v55 = vld [vmem:[#allocation8 + $0x58] sm:$0xff]  }
 0x145   :  { %1809 = vmatpush1.bf16.msra.mxu0 %v3582_v56  ;;  %1973 = vmatpush1.bf16.msra.mxu1 %v3585_v57  ;;  %v3721_v56 = vld [vmem:[#allocation8 + $0x18] sm:$0xff]   ;;  %v3722_v57 = vld [vmem:[#allocation8 + $0x60] sm:$0xff]  }
 0x146   :  { %1810 = vmatprep.subr.bf16.mxu0 %v3590_v58  ;;  %1974 = vmatprep.subr.bf16.mxu1 %v3593_v59  ;;  %v3723_v58 = vld [vmem:[#allocation8 + $0x20] sm:$0xff]   ;;  %v3724_v59 = vld [vmem:[#allocation8 + $0x68] sm:$0xff]  }
 0x149   :  { %1811 = vmatpush1.bf16.msra.mxu0 %v3588_v60  ;;  %1975 = vmatpush1.bf16.msra.mxu1 %v3591_v61  ;;  %v3725_v60 = vld [vmem:[#allocation8 + $0x28] sm:$0xff]   ;;  %v365_v61 = vlaneseq }
 0x14a   :  { %1812 = vmatprep.subr.bf16.mxu0 %v3596_v62  ;;  %1976 = vmatprep.subr.bf16.mxu1 %v3599_v63 }
 0x14b   :  { %v4000_v62 = vshrl.u32 %v365_v61, 7  ;;  %v3728_v61 = vld [vmem:[#allocation8 + $0x78] sm:$0xff]  }
 0x14d   :  { %1813 = vmatpush1.bf16.msra.mxu0 %v3594_v0  ;;  %1977 = vmatpush1.bf16.msra.mxu1 %v3597_v1  ;;  %v367_v63 = vsub.s32 0, %v4000_v62  ;;  %v4006_v0 = vld [vmem:[%s4052_s5] sm:$0xf]  ;;  %v371_v1 = vsub.s32 1, %v4000_v62 }
 0x14e   :  { %1814 = vmatprep.subr.bf16.mxu0 %v3602_v2  ;;  %1978 = vmatprep.subr.bf16.mxu1 %v3605_v3  ;;  %v379_v2 = vsub.s32 3, %v4000_v62 }
 0x14f   :  { %v368_v3 = vrot.slane %v4006_v0, %v367_v63 }
 0x151   :  { %1815 = vmatpush1.bf16.msra.mxu0 %v3600_v4  ;;  %1979 = vmatpush1.bf16.msra.mxu1 %v3603_v5  ;;  %v372_v4 = vrot.slane %v4006_v0, %v371_v1  ;;  %v380_v5 = vrot.slane %v4006_v0, %v379_v2  ;;  %v3889_v2 = vmov 0.0  }
 0x152   :  { %1816 = vmatprep.subr.bf16.mxu0 %v3608_v6  ;;  %1980 = vmatprep.subr.bf16.mxu1 %v3611_v7 }
 0x155   :  { %1817 = vmatpush1.bf16.msra.mxu0 %v3606_v8  ;;  %1981 = vmatpush1.bf16.msra.mxu1 %v3609_v9 }
 0x156   :  { %1818 = vmatprep.subr.bf16.mxu0 %v3614_v10  ;;  %1982 = vmatprep.subr.bf16.mxu1 %v3617_v11 }
 0x159   :  { %1819 = vmatpush1.bf16.msra.mxu0 %v3612_v12  ;;  %1983 = vmatpush1.bf16.msra.mxu1 %v3615_v13 }
 0x15a   :  { %2397 = vmatprep.subr.bf16.mxu0 %v3620_v15  ;;  %3135 = vmatprep.subr.bf16.mxu1 %v3714_v49  ;;  %v3707_v49 = vld [vmem:[#allocation7 + $0x1d4] ss:$8 sps:$4 sm:$0xff]  }
 0x15c   :  { %1821 = vmatmul.mubr.bf16.vlgmr.msra.gmra.mrb[0].mxu0 %v361_v16  ;;  %1985 = vmatmul.mubr.bf16.vlgmr.msra.gmra.mrb[0].mxu1 %v361_v16 }
 0x15d   :  { %2398 = vmatpush1.bf16.msra.mxu0 %v3618_v17  ;;  %3136 = vmatpush3.bf16.msra.mxu1 %v3715_v50  ;;  %v3705_v50 = vld [vmem:[#allocation7 + $0x1d0] ss:$8 sps:$4 sm:$0xff]  }
 0x15e   :  { %2399 = vmatprep.subr.bf16.mxu0 %v3623_v18  ;;  %3137 = vmatprep.subr.bf16.mxu1 %v3716_v51 }
 0x161   :  { %2400 = vmatpush1.bf16.msra.mxu0 %v3621_v19  ;;  %3138 = vmatpush3.bf16.msra.mxu1 %v3717_v52  ;;  %v3710_v52 = vld [vmem:[#allocation7 + $0x1e4] ss:$8 sps:$4 sm:$0xff]  }
 0x162   :  { %2401 = vmatprep.subr.bf16.mxu0 %v3626_v20  ;;  %3139 = vmatprep.subr.bf16.mxu1 %v3718_v53  ;;  %v3708_v53 = vld [vmem:[#allocation7 + $0x1e0] ss:$8 sps:$4 sm:$0xff]  }
 0x165   :  { %2402 = vmatpush1.bf16.msra.mxu0 %v3624_v21  ;;  %3140 = vmatpush3.bf16.msra.mxu1 %v3719_v54  ;;  %v3666_v21 = vld [vmem:[#allocation7 + $0x100] ss:$8 sps:$4 sm:$0xff]  }
 0x166   :  { %2403 = vmatprep.subr.bf16.mxu0 %v3629_v22  ;;  %3141 = vmatprep.subr.bf16.mxu1 %v3720_v55  ;;  %v3713_v55 = vld [vmem:[#allocation7 + $0x1f4] ss:$8 sps:$4 sm:$0xff]  }
 0x169   :  { %2404 = vmatpush1.bf16.msra.mxu0 %v3627_v23  ;;  %3142 = vmatpush3.bf16.msra.mxu1 %v3721_v56  ;;  %v3671_v23 = vld [vmem:[#allocation7 + $0x114] ss:$8 sps:$4 sm:$0xff]   ;;  %v3711_v56 = vld [vmem:[#allocation7 + $0x1f0] ss:$8 sps:$4 sm:$0xff]  }
 0x16a   :  { %2405 = vmatprep.subr.bf16.mxu0 %v3632_v24  ;;  %3143 = vmatprep.subr.bf16.mxu1 %v3722_v57 }
 0x16d   :  { %2406 = vmatpush1.bf16.msra.mxu0 %v3630_v25  ;;  %3144 = vmatpush3.bf16.msra.mxu1 %v3723_v58  ;;  %v3669_v25 = vld [vmem:[#allocation7 + $0x110] ss:$8 sps:$4 sm:$0xff]  }
 0x16e   :  { %2407 = vmatprep.subr.bf16.mxu0 %v3635_v26  ;;  %3145 = vmatprep.subr.bf16.mxu1 %v3724_v59  ;;  %v3674_v26 = vld [vmem:[#allocation7 + $0x124] ss:$8 sps:$4 sm:$0xff]   ;;  %v3726_v59 = vld [vmem:[#allocation8 + $0x70] sm:$0xff]  }
 0x171   :  { %2408 = vmatpush1.bf16.msra.mxu0 %v3633_v27  ;;  %3146 = vmatpush3.bf16.msra.mxu1 %v3725_v60  ;;  %v3672_v27 = vld [vmem:[#allocation7 + $0x120] ss:$8 sps:$4 sm:$0xff]   ;;  %v3727_v60 = vld [vmem:[#allocation8 + $0x30] sm:$0xff]  }
 0x172   :  { %2409 = vmatprep.subr.bf16.mxu0 %v3638_v28  ;;  %v3677_v28 = vld [vmem:[#allocation7 + $0x134] ss:$8 sps:$4 sm:$0xff]   ;;  %3147 = vmatprep.subr.bf16.mxu1 %v3726_v59 }
 0x175   :  { %2410 = vmatpush1.bf16.msra.mxu0 %v3636_v29  ;;  %v3675_v29 = vld [vmem:[#allocation7 + $0x130] ss:$8 sps:$4 sm:$0xff]   ;;  %3148 = vmatpush3.bf16.msra.mxu1 %v3727_v60 }
 0x176   :  { %2411 = vmatprep.subr.bf16.mxu0 %v3641_v30  ;;  %v3680_v30 = vld [vmem:[#allocation7 + $0x144] ss:$8 sps:$4 sm:$0xff]   ;;  %3149 = vmatprep.subr.bf16.mxu1 %v3728_v61 }
 0x179   :  { %2412 = vmatpush1.bf16.msra.mxu0 %v3639_v31  ;;  %v3678_v31 = vld [vmem:[#allocation7 + $0x140] ss:$8 sps:$4 sm:$0xff]  }
 0x17a   :  { %2413 = vmatprep.subr.bf16.mxu0 %v3644_v32  ;;  %v3683_v32 = vld [vmem:[#allocation7 + $0x154] ss:$8 sps:$4 sm:$0xff]  }
 0x17d   :  { %2414 = vmatpush1.bf16.msra.mxu0 %v3642_v33  ;;  %v3681_v33 = vld [vmem:[#allocation7 + $0x150] ss:$8 sps:$4 sm:$0xff]  }
 0x17e   :  { %2415 = vmatprep.subr.bf16.mxu0 %v3647_v34  ;;  %v3686_v34 = vld [vmem:[#allocation7 + $0x164] ss:$8 sps:$4 sm:$0xff]  }
 0x181   :  { %2416 = vmatpush1.bf16.msra.mxu0 %v3645_v35  ;;  %v3684_v35 = vld [vmem:[#allocation7 + $0x160] ss:$8 sps:$4 sm:$0xff]  }
 0x182   :  { %2417 = vmatprep.subr.bf16.mxu0 %v3650_v36  ;;  %v3689_v36 = vld [vmem:[#allocation7 + $0x174] ss:$8 sps:$4 sm:$0xff]  }
 0x185   :  { %2418 = vmatpush1.bf16.msra.mxu0 %v3648_v37  ;;  %v3687_v37 = vld [vmem:[#allocation7 + $0x170] ss:$8 sps:$4 sm:$0xff]  }
 0x186   :  { %2419 = vmatprep.subr.bf16.mxu0 %v3653_v38  ;;  %v3692_v38 = vld [vmem:[#allocation7 + $0x184] ss:$8 sps:$4 sm:$0xff]  }
 0x189   :  { %2420 = vmatpush1.bf16.msra.mxu0 %v3651_v39  ;;  %v3690_v39 = vld [vmem:[#allocation7 + $0x180] ss:$8 sps:$4 sm:$0xff]  }
 0x18a   :  { %2421 = vmatprep.subr.bf16.mxu0 %v3656_v40  ;;  %v3695_v40 = vld [vmem:[#allocation7 + $0x194] ss:$8 sps:$4 sm:$0xff]  }
 0x18d   :  { %2422 = vmatpush1.bf16.msra.mxu0 %v3654_v41  ;;  %v3693_v41 = vld [vmem:[#allocation7 + $0x190] ss:$8 sps:$4 sm:$0xff]  }
 0x18e   :  { %2423 = vmatprep.subr.bf16.mxu0 %v3659_v42  ;;  %v3698_v42 = vld [vmem:[#allocation7 + $0x1a4] ss:$8 sps:$4 sm:$0xff]  }
 0x191   :  { %2424 = vmatpush1.bf16.msra.mxu0 %v3657_v43  ;;  %v3696_v43 = vld [vmem:[#allocation7 + $0x1a0] ss:$8 sps:$4 sm:$0xff]  }
 0x192   :  { %2425 = vmatprep.subr.bf16.mxu0 %v3662_v44  ;;  %v3701_v44 = vld [vmem:[#allocation7 + $0x1b4] ss:$8 sps:$4 sm:$0xff]  }
 0x195   :  { %2426 = vmatpush1.bf16.msra.mxu0 %v3660_v45  ;;  %v3699_v45 = vld [vmem:[#allocation7 + $0x1b0] ss:$8 sps:$4 sm:$0xff]  }
 0x196   :  { %2427 = vmatprep.subr.bf16.mxu0 %v3665_v46  ;;  %v3704_v46 = vld [vmem:[#allocation7 + $0x1c4] ss:$8 sps:$4 sm:$0xff]  }
 0x199   :  { %2428 = vmatpush1.bf16.msra.mxu0 %v3663_v47  ;;  %v3702_v47 = vld [vmem:[#allocation7 + $0x1c0] ss:$8 sps:$4 sm:$0xff]  }
 0x19a   :  { %2438 = vmatprep.subr.bf16.mxu0 %v3668_v48  ;;  %v375_v48 = vsub.s32 2, %v4000_v62  ;;  %v3733_v62 = vld [vmem:[#allocation10 + $0x18] sm:$0xff]  }
 0x19c   :  { %v376_v51 = vrot.slane %v4006_v0, %v375_v48  ;;  %v3729_v0 = vld [vmem:[#allocation8 + $0x38] sm:$0xff]  }
 0x19d   :  { %3150 = vmatpush3.bf16.msra.mxu1 %v3729_v0 }
 0x19e   :  { %3166 = vmatprep.subr.bf16.mxu1 %v3889_v2 }
 0x22f   :  { %v1822_v6 = vpop.f32.mrb[0].mxu0  ;;  %v4017_v7 = vpop.f32.mrb[0].mxu1 }
 0x230   :  { %v3186_v8 = vadd.f32 %v1822_v6, %v368_v3  ;;  %v1824_v9 = vpop.f32.mrb[1].mxu0  ;;  %v1988_v10 = vpop.f32.mrb[1].mxu1  ;;  %v3188_v54 = vadd.f32 %v4017_v7, %v376_v51  ;;  %v2065_v3 = vld [vmem:[%s4052_s5 + $0x4] sm:$0x3] }
 0x231   :  { %v3187_v11 = vadd.f32 %v1824_v9, %v372_v4  ;;  %v3189_v12 = vadd.f32 %v1988_v10, %v380_v5  ;;  %v1826_v13 = vpop.f32.mrb[2].mxu0  ;;  %v1990_v14 = vpop.f32.mrb[2].mxu1  ;;  %v2070_v4 = vrot.slane %v2065_v3, %v367_v63  ;;  %v2074_v5 = vrot.slane %v2065_v3, %v371_v1  ;;  %v3732_v63 = vld [vmem:[#allocation10 + $0x10] sm:$0xff]   ;;  %v3734_v1 = vld [vmem:[#allocation10 + $0x20] sm:$0xff]  }
 0x232   :  { %v1993_v15 = vmax.f32 %v3186_v8, 0.0  ;;  %v1827_v16 = vpop.f32.mrb[3].mxu0  ;;  %v1991_v17 = vpop.f32.mrb[3].mxu1  ;;  %v1995_v57 = vmax.f32 %v3188_v54, 0.0 }
 0x233   :  { %v1994_v18 = vmax.f32 %v3187_v11, 0.0  ;;  %v1996_v19 = vmax.f32 %v3189_v12, 0.0  ;;  %v3731_v17 = vld [vmem:[#allocation10 + $0x8] sm:$0xff]  }
 0x234   :  { %v2061_v22 = vpack.c.bf16 %v1993_v15, %v1993_v15  ;;  %v2063_v58 = vpack.c.bf16 %v1995_v57, %v1995_v57  ;;  %v3730_v15 = vld [vmem:[#allocation10] sm:$0xff]  }
 0x235   :  { %v2062_v20 = vpack.c.bf16 %v1994_v18, %v1994_v18  ;;  %v2064_v24 = vpack.c.bf16 %v1996_v19, %v1996_v19  ;;  %v3735_v18 = vld [vmem:[#allocation10 + $0x28] sm:$0xff]   ;;  %v3736_v19 = vld [vmem:[#allocation10 + $0x30] sm:$0xff]  }
 0x237   :  { %2429 = vmatprep.mubr.bf16.mxu0 %v2062_v20  ;;  %v3737_v20 = vld [vmem:[#allocation10 + $0x38] sm:$0xff]  }
 0x238   :  { %2430 = vmatmul.mubr.bf16.vlgmr.msra.gmra.mrb[4].mxu0 %v2061_v22  ;;  %v3109_v22 = vld [vmem:[%s4052_s5 + $0x6] ss:$0 sm:$0xff] }
 0x239   :  { %2439 = vmatpush1.bf16.msra.mxu0 %v3666_v21  ;;  %2470 = vmatprep.mubr.bf16.mxu0 %v2064_v24 }
 0x23a   :  { %2440 = vmatprep.subr.bf16.mxu0 %v3671_v23 }
 0x23d   :  { %2441 = vmatpush1.bf16.msra.mxu0 %v3669_v25 }
 0x23e   :  { %2442 = vmatprep.subr.bf16.mxu0 %v3674_v26 }
 0x241   :  { %2443 = vmatpush1.bf16.msra.mxu0 %v3672_v27 }
 0x242   :  { %2444 = vmatprep.subr.bf16.mxu0 %v3677_v28 }
 0x245   :  { %2445 = vmatpush1.bf16.msra.mxu0 %v3675_v29 }
 0x246   :  { %2446 = vmatprep.subr.bf16.mxu0 %v3680_v30  ;;  %v3126_v30 = vld [vmem:[%s4052_s5 + $0x7] ss:$0 sm:$0xff] }
 0x249   :  { %2447 = vmatpush1.bf16.msra.mxu0 %v3678_v31 }
 0x24a   :  { %2448 = vmatprep.subr.bf16.mxu0 %v3683_v32 }
 0x24d   :  { %2449 = vmatpush1.bf16.msra.mxu0 %v3681_v33 }
 0x24e   :  { %2450 = vmatprep.subr.bf16.mxu0 %v3686_v34 }
 0x251   :  { %2451 = vmatpush1.bf16.msra.mxu0 %v3684_v35 }
 0x252   :  { %2452 = vmatprep.subr.bf16.mxu0 %v3689_v36 }
 0x255   :  { %2453 = vmatpush1.bf16.msra.mxu0 %v3687_v37 }
 0x256   :  { %2454 = vmatprep.subr.bf16.mxu0 %v3692_v38 }
 0x259   :  { %2455 = vmatpush1.bf16.msra.mxu0 %v3690_v39 }
 0x25a   :  { %2456 = vmatprep.subr.bf16.mxu0 %v3695_v40 }
 0x25d   :  { %2457 = vmatpush1.bf16.msra.mxu0 %v3693_v41 }
 0x25e   :  { %2458 = vmatprep.subr.bf16.mxu0 %v3698_v42 }
 0x261   :  { %2459 = vmatpush1.bf16.msra.mxu0 %v3696_v43 }
 0x262   :  { %2460 = vmatprep.subr.bf16.mxu0 %v3701_v44 }
 0x265   :  { %2461 = vmatpush1.bf16.msra.mxu0 %v3699_v45 }
 0x266   :  { %2462 = vmatprep.subr.bf16.mxu0 %v3704_v46 }
 0x269   :  { %2463 = vmatpush1.bf16.msra.mxu0 %v3702_v47 }
 0x26a   :  { %2464 = vmatprep.subr.bf16.mxu0 %v3707_v49 }
 0x26d   :  { %2465 = vmatpush1.bf16.msra.mxu0 %v3705_v50 }
 0x26e   :  { %2466 = vmatprep.subr.bf16.mxu0 %v3710_v52 }
 0x271   :  { %2467 = vmatpush1.bf16.msra.mxu0 %v3708_v53 }
 0x272   :  { %2468 = vmatprep.subr.bf16.mxu0 %v3713_v55 }
 0x275   :  { %2469 = vmatpush1.bf16.msra.mxu0 %v3711_v56 }
 0x278   :  { %2471 = vmatmul.mubr.bf16.vlgmr.msra.gmra.mrb[4].mxu0 %v2063_v58 }
 0x34b   :  { %v2472_v6 = vpop.f32.mrb[4].mxu0 }
 0x34c   :  { %v3190_v7 = vadd.f32 %v2472_v6, %v2070_v4  ;;  %v2474_v8 = vpop.f32.mrb[5].mxu0 }
 0x34d   :  { %v3191_v9 = vadd.f32 %v2474_v8, %v2074_v5  ;;  %v2476_v10 = vpop.f32.mrb[6].mxu0 }
 0x34e   :  { %v2479_v11 = vmax.f32 %v3190_v7, 0.0  ;;  %v2477_v12 = vpop.f32.mrb[7].mxu0 }
 0x34f   :  { %v2480_v13 = vmax.f32 %v3191_v9, 0.0 }
 0x350   :  { %v2513_v16 = vpack.c.bf16 %v2479_v11, %v2479_v11 }
 0x351   :  { %v2514_v14 = vpack.c.bf16 %v2480_v13, %v2480_v13 }
 0x353   :  { %2650 = vmatprep.mubr.bf16.mxu1 %v2514_v14 }
 0x354   :  { %2651 = vmatmul.mubr.bf16.vlgmr.msra.gmra.mrb[4].mxu1 %v2513_v16 }
 0x355   :  { %3167 = vmatpush3.bf16.msra.mxu1 %v3730_v15  ;;  %3182 = vmatprep.mubr.msk.bf16.mxu1 %vm3890_vm0, %v3889_v2 }
 0x356   :  { %3168 = vmatprep.subr.bf16.mxu1 %v3889_v2 }
 0x359   :  { %3169 = vmatpush3.bf16.msra.mxu1 %v3731_v17 }
 0x35a   :  { %3170 = vmatprep.subr.bf16.mxu1 %v3889_v2 }
 0x35d   :  { %3171 = vmatpush3.bf16.msra.mxu1 %v3732_v63 }
 0x35e   :  { %3172 = vmatprep.subr.bf16.mxu1 %v3889_v2 }
 0x361   :  { %3173 = vmatpush3.bf16.msra.mxu1 %v3733_v62 }
 0x362   :  { %3174 = vmatprep.subr.bf16.mxu1 %v3889_v2 }
 0x365   :  { %3175 = vmatpush3.bf16.msra.mxu1 %v3734_v1 }
 0x366   :  { %3176 = vmatprep.subr.bf16.mxu1 %v3889_v2 }
 0x369   :  { %3177 = vmatpush3.bf16.msra.mxu1 %v3735_v18 }
 0x36a   :  { %3178 = vmatprep.subr.bf16.mxu1 %v3889_v2 }
 0x36d   :  { %3179 = vmatpush3.bf16.msra.mxu1 %v3736_v19 }
 0x36e   :  { %3180 = vmatprep.subr.bf16.mxu1 %v3889_v2 }
 0x371   :  { %3181 = vmatpush3.bf16.msra.mxu1 %v3737_v20 }
 0x427   :  { %v3151_v21 = vpop.f32.mrb[4].mxu1 }
 0x428   :  { %v3152_v23 = vpop.f32.mrb[5].mxu1 }
 0x429   :  { %v3153_v24 = vadd.f32 %v3152_v23, %v3151_v21  ;;  %v3154_v25 = vpop.f32.mrb[6].mxu1 }
 0x42a   :  { %v3155_v26 = vpop.f32.mrb[7].mxu1 }
 0x42b   :  { %v2653_v27 = vadd.f32 %v3153_v24, %v3109_v22 }
 0x42d   :  { %v2658_v28 = vmax.f32 %v2653_v27, 0.0 }
 0x42f   :  { %v2675_v29 = vpack.c.bf16 %v2658_v28, %v2658_v28 }
 0x431   :  { %3183 = vmatmul.mubr.bf16.vlgmr.msra.gmra.mrb[8].mxu1 %v2675_v29 }
 0x504   :  { %v2765_v31 = vpop.f32.mrb[8].mxu1 }
 0x505   :  { %v2766_v32 = vadd.f32 %v3126_v30, %v2765_v31  ;;  %v3184_v33 = vpop.f32.mrb[9].mxu1 }
 0x506   :  { %v2768_v34 = vpop.f32.mrb[10].mxu1 }
 0x507   :  { %2771 = vst [vmem:[#allocation11] sm:$0xff] %v2766_v32  ;;  %v3185_v35 = vpop.f32.mrb[11].mxu1 }
 0x508   :  { %3859 = shalt.err (!%p3856_p2)
}
 0x509   :  { %s3860_s5 = scalar_lea.hbm %s4053_s6, 128 }
 0x50a   :  { %p3861_p3 = scmp.ne.s32.totalorder %s4053_s6, %s3860_s5  ;;  %p3864_p4 = scmp.lt.u32.totalorder %s3860_s5, %s4053_s6 }
 0x50c   :  { %p3866_p5 = pnand %p3864_p4, %p3861_p3 }
 0x50e   :  { %3869 = shalt.err (!%p3866_p5)
}
 0x50f   :  { %2781 = dma.vmem_to_hbm [thread:$0]  %s2779_s17, 128, %s4053_s6, [#allocation4]  }
 0x510   :  { %3876 = dma.done.wait [#allocation4], 128  }
 0x511   :  { %3877 = vsyncadd [#allocation4], 4294967168 }
 0x512   :  { %2785 = vsyncpa [#allocation3], 1 }
 0x513   :  { %2786 = vsyncpa [#allocation6], 1 }
 0x514   :  { %2787 = vsyncpa [#allocation9], 1 }
 0x515   :  { %2788 = vsyncpa [#allocation4], 1 }

</bundles_post_ra>
